<compile_context>
chip_gen: v6e
topology: v6e:2x2x1
jax: 0.10.0
libtpu: 0.0.40
codegen_flags: <defaults>
</compile_context>

<pallas_src>
import jax
import jax.numpy as jnp
from jax import lax
from jax.experimental import pallas as pl
from jax.experimental.pallas import tpu as pltpu


def _make_cbow_kernel(tb, tv, ctx, d):
    inv_c = 1.0 / float(ctx)

    def kernel(ids_ref,    # SMEM (B, C) int32     (scalar prefetch)
               emb_hbm,    # ANY  (V, D) f32       (embedding table, raw ref)
               w_ref,      # VMEM (TV, D) f32      (weight tile)
               b_ref,      # VMEM (1, TV) f32      (bias tile)
               out_ref,    # VMEM (TB, V) f32      (resident across vj)
               mean_ref,   # VMEM (TB, D) f32      scratch: context mean
               m_ref,      # VMEM (TB, 1) f32      scratch: running max
               l_ref,      # VMEM (TB, 1) f32      scratch: running sum-exp
               gbuf,       # VMEM (2, C, D) f32    scratch: gather double-buffer
               sems):      # DMA semaphores (2, C)
        bi = pl.program_id(0)
        vj = pl.program_id(1)
        nv = pl.num_programs(1)

        # ----- once per batch tile: fused embedding gather + context mean -----
        @pl.when(vj == 0)
        def _():
            def start_fetch(b_local, slot):
                row = bi * tb + b_local
                for c in range(ctx):
                    tok = ids_ref[row, c]
                    pltpu.make_async_copy(
                        emb_hbm.at[pl.ds(tok, 1), :],
                        gbuf.at[slot, pl.ds(c, 1), :],
                        sems.at[slot, c],
                    ).start()

            def wait_fetch(slot):
                for c in range(ctx):
                    pltpu.make_async_copy(
                        emb_hbm.at[pl.ds(0, 1), :],
                        gbuf.at[slot, pl.ds(c, 1), :],
                        sems.at[slot, c],
                    ).wait()

            start_fetch(0, 0)

            def body(b_local, carry):
                slot = b_local & 1
                wait_fetch(slot)

                @pl.when(b_local + 1 < tb)
                def _():
                    start_fetch(b_local + 1, 1 - slot)

                mean_ref[pl.ds(b_local, 1), :] = jnp.sum(
                    gbuf[slot], axis=0, keepdims=True)
                return carry

            lax.fori_loop(0, tb, body, 0)
            # fold the 1/C of the context mean in one pass
            mean_ref[...] = mean_ref[...] * inv_c

            m_ref[...] = jnp.full((tb, 1), -jnp.inf, dtype=jnp.float32)
            l_ref[...] = jnp.zeros((tb, 1), dtype=jnp.float32)

        # ----- logits tile: mean @ W[v_tile].T + b[v_tile]  (MXU, contract D) -----
        logits = lax.dot_general(
            mean_ref[...], w_ref[...],
            dimension_numbers=(((1,), (1,)), ((), ())),
            preferred_element_type=jnp.float32) + b_ref[...]

        # ----- online log-sum-exp across V tiles -----
        m_prev = m_ref[...]
        m_new = jnp.maximum(m_prev, jnp.max(logits, axis=1, keepdims=True))
        l_ref[...] = (l_ref[...] * jnp.exp(m_prev - m_new)
                      + jnp.sum(jnp.exp(logits - m_new), axis=1, keepdims=True))
        m_ref[...] = m_new

        col = vj * tv
        if tv % 128 == 0:
            col = pl.multiple_of(col, 128)
        out_ref[:, pl.ds(col, tv)] = logits

        # ----- finalize: subtract lse once every V tile has been produced -----
        @pl.when(vj == nv - 1)
        def _():
            lse = m_ref[...] + jnp.log(l_ref[...])
            out_ref[...] = out_ref[...] - lse

    return kernel


def _pick_tile(dim, candidates):
    for t in candidates:
        if dim % t == 0:
            return t
    return dim


def cbow_forward(token_ids, emb_table, lin_weight, lin_bias, *, tb=None, tv=None):
    """log_softmax(mean_c(Emb[ids]) @ W.T + b).

    token_ids : (B, C) int32
    emb_table : (V, D) f32   nn.Embedding weight
    lin_weight: (V, D) f32   nn.Linear weight (native layout, no transpose)
    lin_bias  : (V,)   f32
    returns   : (B, V) f32 log-probabilities
    """
    B, C = token_ids.shape
    V, D = emb_table.shape
    assert lin_weight.shape == (V, D) and lin_bias.shape == (V,)

    if tb is None:
        tb = _pick_tile(B, (128, 64, 32, 16, 8))
    if tv is None:
        tv = _pick_tile(V, (2048, 1024, 512, 256, 128))
    assert B % tb == 0 and (tb % 8 == 0 or tb == B)
    assert V % tv == 0 and (tv % 128 == 0 or tv == V)
    n_b, n_v = B // tb, V // tv

    kernel = _make_cbow_kernel(tb, tv, C, D)

    # VMEM budget: double-buffered weight/bias tiles, resident (TB, V) output
    # block, mean / (m, l) scratch and the gather double-buffer; with headroom.
    # (Re-derive tb/tv downward for v7x's 64 MiB VMEM at large V.)
    vmem_bytes = 4 * (2 * (tv * D + 8 * tv)    # weight + bias double buffers
                      + 2 * tb * V             # output block
                      + tb * D                 # context-mean scratch
                      + 2 * tb * 128           # m / l scratch (lane padded)
                      + 2 * C * D)             # gather double buffer
    vmem_bytes = min(max(int(1.5 * vmem_bytes) + (4 << 20), 16 << 20), 64 << 20)

    grid_spec = pltpu.PrefetchScalarGridSpec(
        num_scalar_prefetch=1,
        grid=(n_b, n_v),
        in_specs=[
            pl.BlockSpec(memory_space=pl.ANY),                     # emb table (HBM)
            pl.BlockSpec((tv, D), lambda bi, vj, ids: (vj, 0)),    # weight tile
            pl.BlockSpec((1, tv), lambda bi, vj, ids: (0, vj)),    # bias tile
        ],
        out_specs=pl.BlockSpec((tb, V), lambda bi, vj, ids: (bi, 0)),
        scratch_shapes=[
            pltpu.VMEM((tb, D), jnp.float32),      # context mean
            pltpu.VMEM((tb, 1), jnp.float32),      # running max
            pltpu.VMEM((tb, 1), jnp.float32),      # running sum-exp
            pltpu.VMEM((2, C, D), jnp.float32),    # gather double buffer
            pltpu.SemaphoreType.DMA((2, C)),       # per-row DMA semaphores
        ],
    )

    return pl.pallas_call(
        kernel,
        out_shape=jax.ShapeDtypeStruct((B, V), jnp.float32),
        grid_spec=grid_spec,
        compiler_params=pltpu.CompilerParams(
            dimension_semantics=("parallel", "arbitrary"),
            vmem_limit_bytes=vmem_bytes),
    )(token_ids.astype(jnp.int32), emb_table, lin_weight, lin_bias.reshape(1, V))


if __name__ == "__main__":
    # Small deterministic setup; tile sizes chosen so both grid axes are > 1.
    vocab_size = 256      # V
    embedding_dim = 128   # D
    batch = 16            # B
    context = 8           # C

    key = jax.random.PRNGKey(0)
    k_ids, k_emb, k_w, k_b = jax.random.split(key, 4)

    token_ids = jax.random.randint(k_ids, (batch, context), 0, vocab_size,
                                   dtype=jnp.int32)
    emb_table = jax.random.normal(k_emb, (vocab_size, embedding_dim),
                                  dtype=jnp.float32) * 0.1
    lin_weight = jax.random.normal(k_w, (vocab_size, embedding_dim),
                                   dtype=jnp.float32) * 0.1
    lin_bias = jax.random.normal(k_b, (vocab_size,), dtype=jnp.float32) * 0.1

    log_probs = cbow_forward(token_ids, emb_table, lin_weight, lin_bias,
                             tb=8, tv=128)   # grid = (2, 2)
    jax.block_until_ready(log_probs)

    # Reference check against plain-JAX forward.
    embed_mean = jnp.take(emb_table, token_ids, axis=0).mean(axis=1)
    logits_ref = embed_mean @ lin_weight.T + lin_bias
    ref = jax.nn.log_softmax(logits_ref, axis=1)
    assert log_probs.shape == (batch, vocab_size)
    assert jnp.allclose(log_probs, ref, atol=2e-5, rtol=1e-5)

    print("KERNEL_OK")
</pallas_src>

<mosaic_0001>
module attributes {stable_mosaic.version = 11 : i64} {
  func.func @kernel(%arg0: i32, %arg1: i32, %arg2: memref<16x8xi32, #tpu.memory_space<smem>>, %arg3: memref<256x128xf32, #tpu.memory_space<any>>, %arg4: memref<128x128xf32, #tpu.memory_space<vmem>>, %arg5: memref<1x128xf32, #tpu.memory_space<vmem>>, %arg6: memref<8x256xf32, #tpu.memory_space<vmem>>, %arg7: memref<8x128xf32, #tpu.memory_space<vmem>>, %arg8: memref<8x1xf32, #tpu.memory_space<vmem>>, %arg9: memref<8x1xf32, #tpu.memory_space<vmem>>, %arg10: memref<2x8x128xf32, #tpu.memory_space<vmem>>, %arg11: memref<2x8x!tpu.dma_semaphore, #tpu.memory_space<semaphore_mem>>) attributes {dimension_semantics = [#tpu.dimension_semantics<parallel>, #tpu.dimension_semantics<arbitrary>], iteration_bounds = array<i64: 2, 2>, scalar_prefetch = 1 : i64, scratch_operands = 5 : i64, tpu.core_type = #tpu.core_type<tc>, window_params = [{}, {transform_indices = @transform_1, window_bounds = array<i64: 128, 128>}, {transform_indices = @transform_2, window_bounds = array<i64: 1, 128>}, {transform_indices = @transform_3, window_bounds = array<i64: 8, 256>}]} {
    %c0_i32 = arith.constant 0 : i32
    %0 = arith.cmpi eq, %arg1, %c0_i32 : i32
    %1 = arith.extui %0 : i1 to i32
    %c0_i32_0 = arith.constant 0 : i32
    %2 = arith.cmpi ne, %1, %c0_i32_0 : i32
    scf.if %2 {
      %c8_i32 = arith.constant 8 : i32
      %32 = arith.muli %arg0, %c8_i32 : i32
      %c0_i32_18 = arith.constant 0 : i32
      %33 = arith.addi %32, %c0_i32_18 : i32
      %34 = arith.index_cast %33 : i32 to index
      %c0_19 = arith.constant 0 : index
      %35 = memref.load %arg2[%34, %c0_19] : memref<16x8xi32, #tpu.memory_space<smem>>
      %c0_i32_20 = arith.constant 0 : i32
      %c0_i32_21 = arith.constant 0 : i32
      %c0_i32_22 = arith.constant 0 : i32
      %c0_i32_23 = arith.constant 0 : i32
      %36 = tpu.memref_slice %arg3[%35, %c0_i32_23] : memref<256x128xf32, #tpu.memory_space<any>> -> memref<1x128xf32, #tpu.memory_space<any>>
      %c0_i32_24 = arith.constant 0 : i32
      %c0_i32_25 = arith.constant 0 : i32
      %37 = tpu.memref_slice %arg10[%c0_i32_20, %c0_i32_24, %c0_i32_25] : memref<2x8x128xf32, #tpu.memory_space<vmem>> -> memref<1x1x128xf32, #tpu.memory_space<vmem>>
      %38 = tpu.memref_squeeze %37 : memref<1x1x128xf32, #tpu.memory_space<vmem>> -> memref<1x128xf32, #tpu.memory_space<vmem>>
      %39 = tpu.memref_slice %arg11[%c0_i32_21, %c0_i32_22] : memref<2x8x!tpu.dma_semaphore, #tpu.memory_space<semaphore_mem>> -> memref<1x1x!tpu.dma_semaphore, #tpu.memory_space<semaphore_mem>>
      %40 = tpu.memref_squeeze %39 : memref<1x1x!tpu.dma_semaphore, #tpu.memory_space<semaphore_mem>> -> memref<!tpu.dma_semaphore, #tpu.memory_space<semaphore_mem>>
      tpu.enqueue_dma source(%36 : memref<1x128xf32, #tpu.memory_space<any>>) target(%38 : memref<1x128xf32, #tpu.memory_space<vmem>>) target_semaphore(%40 : memref<!tpu.dma_semaphore, #tpu.memory_space<semaphore_mem>>)
      %41 = arith.index_cast %33 : i32 to index
      %c1 = arith.constant 1 : index
      %42 = memref.load %arg2[%41, %c1] : memref<16x8xi32, #tpu.memory_space<smem>>
      %c0_i32_26 = arith.constant 0 : i32
      %c0_i32_27 = arith.constant 0 : i32
      %c1_i32_28 = arith.constant 1 : i32
      %c0_i32_29 = arith.constant 0 : i32
      %43 = tpu.memref_slice %arg3[%42, %c0_i32_29] : memref<256x128xf32, #tpu.memory_space<any>> -> memref<1x128xf32, #tpu.memory_space<any>>
      %c1_i32_30 = arith.constant 1 : i32
      %c0_i32_31 = arith.constant 0 : i32
      %44 = tpu.memref_slice %arg10[%c0_i32_26, %c1_i32_30, %c0_i32_31] : memref<2x8x128xf32, #tpu.memory_space<vmem>> -> memref<1x1x128xf32, #tpu.memory_space<vmem>>
      %45 = tpu.memref_squeeze %44 : memref<1x1x128xf32, #tpu.memory_space<vmem>> -> memref<1x128xf32, #tpu.memory_space<vmem>>
      %46 = tpu.memref_slice %arg11[%c0_i32_27, %c1_i32_28] : memref<2x8x!tpu.dma_semaphore, #tpu.memory_space<semaphore_mem>> -> memref<1x1x!tpu.dma_semaphore, #tpu.memory_space<semaphore_mem>>
      %47 = tpu.memref_squeeze %46 : memref<1x1x!tpu.dma_semaphore, #tpu.memory_space<semaphore_mem>> -> memref<!tpu.dma_semaphore, #tpu.memory_space<semaphore_mem>>
      tpu.enqueue_dma source(%43 : memref<1x128xf32, #tpu.memory_space<any>>) target(%45 : memref<1x128xf32, #tpu.memory_space<vmem>>) target_semaphore(%47 : memref<!tpu.dma_semaphore, #tpu.memory_space<semaphore_mem>>)
      %48 = arith.index_cast %33 : i32 to index
      %c2 = arith.constant 2 : index
      %49 = memref.load %arg2[%48, %c2] : memref<16x8xi32, #tpu.memory_space<smem>>
      %c0_i32_32 = arith.constant 0 : i32
      %c0_i32_33 = arith.constant 0 : i32
      %c2_i32 = arith.constant 2 : i32
      %c0_i32_34 = arith.constant 0 : i32
      %50 = tpu.memref_slice %arg3[%49, %c0_i32_34] : memref<256x128xf32, #tpu.memory_space<any>> -> memref<1x128xf32, #tpu.memory_space<any>>
      %c2_i32_35 = arith.constant 2 : i32
      %c0_i32_36 = arith.constant 0 : i32
      %51 = tpu.memref_slice %arg10[%c0_i32_32, %c2_i32_35, %c0_i32_36] : memref<2x8x128xf32, #tpu.memory_space<vmem>> -> memref<1x1x128xf32, #tpu.memory_space<vmem>>
      %52 = tpu.memref_squeeze %51 : memref<1x1x128xf32, #tpu.memory_space<vmem>> -> memref<1x128xf32, #tpu.memory_space<vmem>>
      %53 = tpu.memref_slice %arg11[%c0_i32_33, %c2_i32] : memref<2x8x!tpu.dma_semaphore, #tpu.memory_space<semaphore_mem>> -> memref<1x1x!tpu.dma_semaphore, #tpu.memory_space<semaphore_mem>>
      %54 = tpu.memref_squeeze %53 : memref<1x1x!tpu.dma_semaphore, #tpu.memory_space<semaphore_mem>> -> memref<!tpu.dma_semaphore, #tpu.memory_space<semaphore_mem>>
      tpu.enqueue_dma source(%50 : memref<1x128xf32, #tpu.memory_space<any>>) target(%52 : memref<1x128xf32, #tpu.memory_space<vmem>>) target_semaphore(%54 : memref<!tpu.dma_semaphore, #tpu.memory_space<semaphore_mem>>)
      %55 = arith.index_cast %33 : i32 to index
      %c3 = arith.constant 3 : index
      %56 = memref.load %arg2[%55, %c3] : memref<16x8xi32, #tpu.memory_space<smem>>
      %c0_i32_37 = arith.constant 0 : i32
      %c0_i32_38 = arith.constant 0 : i32
      %c3_i32 = arith.constant 3 : i32
      %c0_i32_39 = arith.constant 0 : i32
      %57 = tpu.memref_slice %arg3[%56, %c0_i32_39] : memref<256x128xf32, #tpu.memory_space<any>> -> memref<1x128xf32, #tpu.memory_space<any>>
      %c3_i32_40 = arith.constant 3 : i32
      %c0_i32_41 = arith.constant 0 : i32
      %58 = tpu.memref_slice %arg10[%c0_i32_37, %c3_i32_40, %c0_i32_41] : memref<2x8x128xf32, #tpu.memory_space<vmem>> -> memref<1x1x128xf32, #tpu.memory_space<vmem>>
      %59 = tpu.memref_squeeze %58 : memref<1x1x128xf32, #tpu.memory_space<vmem>> -> memref<1x128xf32, #tpu.memory_space<vmem>>
      %60 = tpu.memref_slice %arg11[%c0_i32_38, %c3_i32] : memref<2x8x!tpu.dma_semaphore, #tpu.memory_space<semaphore_mem>> -> memref<1x1x!tpu.dma_semaphore, #tpu.memory_space<semaphore_mem>>
      %61 = tpu.memref_squeeze %60 : memref<1x1x!tpu.dma_semaphore, #tpu.memory_space<semaphore_mem>> -> memref<!tpu.dma_semaphore, #tpu.memory_space<semaphore_mem>>
      tpu.enqueue_dma source(%57 : memref<1x128xf32, #tpu.memory_space<any>>) target(%59 : memref<1x128xf32, #tpu.memory_space<vmem>>) target_semaphore(%61 : memref<!tpu.dma_semaphore, #tpu.memory_space<semaphore_mem>>)
      %62 = arith.index_cast %33 : i32 to index
      %c4 = arith.constant 4 : index
      %63 = memref.load %arg2[%62, %c4] : memref<16x8xi32, #tpu.memory_space<smem>>
      %c0_i32_42 = arith.constant 0 : i32
      %c0_i32_43 = arith.constant 0 : i32
      %c4_i32 = arith.constant 4 : i32
      %c0_i32_44 = arith.constant 0 : i32
      %64 = tpu.memref_slice %arg3[%63, %c0_i32_44] : memref<256x128xf32, #tpu.memory_space<any>> -> memref<1x128xf32, #tpu.memory_space<any>>
      %c4_i32_45 = arith.constant 4 : i32
      %c0_i32_46 = arith.constant 0 : i32
      %65 = tpu.memref_slice %arg10[%c0_i32_42, %c4_i32_45, %c0_i32_46] : memref<2x8x128xf32, #tpu.memory_space<vmem>> -> memref<1x1x128xf32, #tpu.memory_space<vmem>>
      %66 = tpu.memref_squeeze %65 : memref<1x1x128xf32, #tpu.memory_space<vmem>> -> memref<1x128xf32, #tpu.memory_space<vmem>>
      %67 = tpu.memref_slice %arg11[%c0_i32_43, %c4_i32] : memref<2x8x!tpu.dma_semaphore, #tpu.memory_space<semaphore_mem>> -> memref<1x1x!tpu.dma_semaphore, #tpu.memory_space<semaphore_mem>>
      %68 = tpu.memref_squeeze %67 : memref<1x1x!tpu.dma_semaphore, #tpu.memory_space<semaphore_mem>> -> memref<!tpu.dma_semaphore, #tpu.memory_space<semaphore_mem>>
      tpu.enqueue_dma source(%64 : memref<1x128xf32, #tpu.memory_space<any>>) target(%66 : memref<1x128xf32, #tpu.memory_space<vmem>>) target_semaphore(%68 : memref<!tpu.dma_semaphore, #tpu.memory_space<semaphore_mem>>)
      %69 = arith.index_cast %33 : i32 to index
      %c5 = arith.constant 5 : index
      %70 = memref.load %arg2[%69, %c5] : memref<16x8xi32, #tpu.memory_space<smem>>
      %c0_i32_47 = arith.constant 0 : i32
      %c0_i32_48 = arith.constant 0 : i32
      %c5_i32 = arith.constant 5 : i32
      %c0_i32_49 = arith.constant 0 : i32
      %71 = tpu.memref_slice %arg3[%70, %c0_i32_49] : memref<256x128xf32, #tpu.memory_space<any>> -> memref<1x128xf32, #tpu.memory_space<any>>
      %c5_i32_50 = arith.constant 5 : i32
      %c0_i32_51 = arith.constant 0 : i32
      %72 = tpu.memref_slice %arg10[%c0_i32_47, %c5_i32_50, %c0_i32_51] : memref<2x8x128xf32, #tpu.memory_space<vmem>> -> memref<1x1x128xf32, #tpu.memory_space<vmem>>
      %73 = tpu.memref_squeeze %72 : memref<1x1x128xf32, #tpu.memory_space<vmem>> -> memref<1x128xf32, #tpu.memory_space<vmem>>
      %74 = tpu.memref_slice %arg11[%c0_i32_48, %c5_i32] : memref<2x8x!tpu.dma_semaphore, #tpu.memory_space<semaphore_mem>> -> memref<1x1x!tpu.dma_semaphore, #tpu.memory_space<semaphore_mem>>
      %75 = tpu.memref_squeeze %74 : memref<1x1x!tpu.dma_semaphore, #tpu.memory_space<semaphore_mem>> -> memref<!tpu.dma_semaphore, #tpu.memory_space<semaphore_mem>>
      tpu.enqueue_dma source(%71 : memref<1x128xf32, #tpu.memory_space<any>>) target(%73 : memref<1x128xf32, #tpu.memory_space<vmem>>) target_semaphore(%75 : memref<!tpu.dma_semaphore, #tpu.memory_space<semaphore_mem>>)
      %76 = arith.index_cast %33 : i32 to index
      %c6 = arith.constant 6 : index
      %77 = memref.load %arg2[%76, %c6] : memref<16x8xi32, #tpu.memory_space<smem>>
      %c0_i32_52 = arith.constant 0 : i32
      %c0_i32_53 = arith.constant 0 : i32
      %c6_i32 = arith.constant 6 : i32
      %c0_i32_54 = arith.constant 0 : i32
      %78 = tpu.memref_slice %arg3[%77, %c0_i32_54] : memref<256x128xf32, #tpu.memory_space<any>> -> memref<1x128xf32, #tpu.memory_space<any>>
      %c6_i32_55 = arith.constant 6 : i32
      %c0_i32_56 = arith.constant 0 : i32
      %79 = tpu.memref_slice %arg10[%c0_i32_52, %c6_i32_55, %c0_i32_56] : memref<2x8x128xf32, #tpu.memory_space<vmem>> -> memref<1x1x128xf32, #tpu.memory_space<vmem>>
      %80 = tpu.memref_squeeze %79 : memref<1x1x128xf32, #tpu.memory_space<vmem>> -> memref<1x128xf32, #tpu.memory_space<vmem>>
      %81 = tpu.memref_slice %arg11[%c0_i32_53, %c6_i32] : memref<2x8x!tpu.dma_semaphore, #tpu.memory_space<semaphore_mem>> -> memref<1x1x!tpu.dma_semaphore, #tpu.memory_space<semaphore_mem>>
      %82 = tpu.memref_squeeze %81 : memref<1x1x!tpu.dma_semaphore, #tpu.memory_space<semaphore_mem>> -> memref<!tpu.dma_semaphore, #tpu.memory_space<semaphore_mem>>
      tpu.enqueue_dma source(%78 : memref<1x128xf32, #tpu.memory_space<any>>) target(%80 : memref<1x128xf32, #tpu.memory_space<vmem>>) target_semaphore(%82 : memref<!tpu.dma_semaphore, #tpu.memory_space<semaphore_mem>>)
      %83 = arith.index_cast %33 : i32 to index
      %c7 = arith.constant 7 : index
      %84 = memref.load %arg2[%83, %c7] : memref<16x8xi32, #tpu.memory_space<smem>>
      %c0_i32_57 = arith.constant 0 : i32
      %c0_i32_58 = arith.constant 0 : i32
      %c7_i32 = arith.constant 7 : i32
      %c0_i32_59 = arith.constant 0 : i32
      %85 = tpu.memref_slice %arg3[%84, %c0_i32_59] : memref<256x128xf32, #tpu.memory_space<any>> -> memref<1x128xf32, #tpu.memory_space<any>>
      %c7_i32_60 = arith.constant 7 : i32
      %c0_i32_61 = arith.constant 0 : i32
      %86 = tpu.memref_slice %arg10[%c0_i32_57, %c7_i32_60, %c0_i32_61] : memref<2x8x128xf32, #tpu.memory_space<vmem>> -> memref<1x1x128xf32, #tpu.memory_space<vmem>>
      %87 = tpu.memref_squeeze %86 : memref<1x1x128xf32, #tpu.memory_space<vmem>> -> memref<1x128xf32, #tpu.memory_space<vmem>>
      %88 = tpu.memref_slice %arg11[%c0_i32_58, %c7_i32] : memref<2x8x!tpu.dma_semaphore, #tpu.memory_space<semaphore_mem>> -> memref<1x1x!tpu.dma_semaphore, #tpu.memory_space<semaphore_mem>>
      %89 = tpu.memref_squeeze %88 : memref<1x1x!tpu.dma_semaphore, #tpu.memory_space<semaphore_mem>> -> memref<!tpu.dma_semaphore, #tpu.memory_space<semaphore_mem>>
      tpu.enqueue_dma source(%85 : memref<1x128xf32, #tpu.memory_space<any>>) target(%87 : memref<1x128xf32, #tpu.memory_space<vmem>>) target_semaphore(%89 : memref<!tpu.dma_semaphore, #tpu.memory_space<semaphore_mem>>)
      %c0_i32_62 = arith.constant 0 : i32
      %c8_i32_63 = arith.constant 8 : i32
      %90 = arith.addi %c0_i32_62, %c8_i32_63 : i32
      %c1_i32_64 = arith.constant 1 : i32
      scf.for %arg12 = %c0_i32_62 to %90 step %c1_i32_64  : i32 {
        %c1_i32_77 = arith.constant 1 : i32
        %99 = arith.andi %arg12, %c1_i32_77 : i32
        %c0_i32_78 = arith.constant 0 : i32
        %c0_i32_79 = arith.constant 0 : i32
        %c0_i32_80 = arith.constant 0 : i32
        %100 = tpu.memref_slice %arg3[%c0_i32_79, %c0_i32_80] : memref<256x128xf32, #tpu.memory_space<any>> -> memref<1x128xf32, #tpu.memory_space<any>>
        %c0_i32_81 = arith.constant 0 : i32
        %c0_i32_82 = arith.constant 0 : i32
        %101 = tpu.memref_slice %arg10[%99, %c0_i32_81, %c0_i32_82] : memref<2x8x128xf32, #tpu.memory_space<vmem>> -> memref<1x1x128xf32, #tpu.memory_space<vmem>>
        %102 = tpu.memref_squeeze %101 : memref<1x1x128xf32, #tpu.memory_space<vmem>> -> memref<1x128xf32, #tpu.memory_space<vmem>>
        %103 = tpu.memref_slice %arg11[%99, %c0_i32_78] : memref<2x8x!tpu.dma_semaphore, #tpu.memory_space<semaphore_mem>> -> memref<1x1x!tpu.dma_semaphore, #tpu.memory_space<semaphore_mem>>
        %104 = tpu.memref_squeeze %103 : memref<1x1x!tpu.dma_semaphore, #tpu.memory_space<semaphore_mem>> -> memref<!tpu.dma_semaphore, #tpu.memory_space<semaphore_mem>>
        tpu.wait_dma2 semaphore(%104 : memref<!tpu.dma_semaphore, #tpu.memory_space<semaphore_mem>>) src(%100 : memref<1x128xf32, #tpu.memory_space<any>>) dst(%102 : memref<1x128xf32, #tpu.memory_space<vmem>>)
        %c1_i32_83 = arith.constant 1 : i32
        %c0_i32_84 = arith.constant 0 : i32
        %c0_i32_85 = arith.constant 0 : i32
        %105 = tpu.memref_slice %arg3[%c0_i32_84, %c0_i32_85] : memref<256x128xf32, #tpu.memory_space<any>> -> memref<1x128xf32, #tpu.memory_space<any>>
        %c1_i32_86 = arith.constant 1 : i32
        %c0_i32_87 = arith.constant 0 : i32
        %106 = tpu.memref_slice %arg10[%99, %c1_i32_86, %c0_i32_87] : memref<2x8x128xf32, #tpu.memory_space<vmem>> -> memref<1x1x128xf32, #tpu.memory_space<vmem>>
        %107 = tpu.memref_squeeze %106 : memref<1x1x128xf32, #tpu.memory_space<vmem>> -> memref<1x128xf32, #tpu.memory_space<vmem>>
        %108 = tpu.memref_slice %arg11[%99, %c1_i32_83] : memref<2x8x!tpu.dma_semaphore, #tpu.memory_space<semaphore_mem>> -> memref<1x1x!tpu.dma_semaphore, #tpu.memory_space<semaphore_mem>>
        %109 = tpu.memref_squeeze %108 : memref<1x1x!tpu.dma_semaphore, #tpu.memory_space<semaphore_mem>> -> memref<!tpu.dma_semaphore, #tpu.memory_space<semaphore_mem>>
        tpu.wait_dma2 semaphore(%109 : memref<!tpu.dma_semaphore, #tpu.memory_space<semaphore_mem>>) src(%105 : memref<1x128xf32, #tpu.memory_space<any>>) dst(%107 : memref<1x128xf32, #tpu.memory_space<vmem>>)
        %c2_i32_88 = arith.constant 2 : i32
        %c0_i32_89 = arith.constant 0 : i32
        %c0_i32_90 = arith.constant 0 : i32
        %110 = tpu.memref_slice %arg3[%c0_i32_89, %c0_i32_90] : memref<256x128xf32, #tpu.memory_space<any>> -> memref<1x128xf32, #tpu.memory_space<any>>
        %c2_i32_91 = arith.constant 2 : i32
        %c0_i32_92 = arith.constant 0 : i32
        %111 = tpu.memref_slice %arg10[%99, %c2_i32_91, %c0_i32_92] : memref<2x8x128xf32, #tpu.memory_space<vmem>> -> memref<1x1x128xf32, #tpu.memory_space<vmem>>
        %112 = tpu.memref_squeeze %111 : memref<1x1x128xf32, #tpu.memory_space<vmem>> -> memref<1x128xf32, #tpu.memory_space<vmem>>
        %113 = tpu.memref_slice %arg11[%99, %c2_i32_88] : memref<2x8x!tpu.dma_semaphore, #tpu.memory_space<semaphore_mem>> -> memref<1x1x!tpu.dma_semaphore, #tpu.memory_space<semaphore_mem>>
        %114 = tpu.memref_squeeze %113 : memref<1x1x!tpu.dma_semaphore, #tpu.memory_space<semaphore_mem>> -> memref<!tpu.dma_semaphore, #tpu.memory_space<semaphore_mem>>
        tpu.wait_dma2 semaphore(%114 : memref<!tpu.dma_semaphore, #tpu.memory_space<semaphore_mem>>) src(%110 : memref<1x128xf32, #tpu.memory_space<any>>) dst(%112 : memref<1x128xf32, #tpu.memory_space<vmem>>)
        %c3_i32_93 = arith.constant 3 : i32
        %c0_i32_94 = arith.constant 0 : i32
        %c0_i32_95 = arith.constant 0 : i32
        %115 = tpu.memref_slice %arg3[%c0_i32_94, %c0_i32_95] : memref<256x128xf32, #tpu.memory_space<any>> -> memref<1x128xf32, #tpu.memory_space<any>>
        %c3_i32_96 = arith.constant 3 : i32
        %c0_i32_97 = arith.constant 0 : i32
        %116 = tpu.memref_slice %arg10[%99, %c3_i32_96, %c0_i32_97] : memref<2x8x128xf32, #tpu.memory_space<vmem>> -> memref<1x1x128xf32, #tpu.memory_space<vmem>>
        %117 = tpu.memref_squeeze %116 : memref<1x1x128xf32, #tpu.memory_space<vmem>> -> memref<1x128xf32, #tpu.memory_space<vmem>>
        %118 = tpu.memref_slice %arg11[%99, %c3_i32_93] : memref<2x8x!tpu.dma_semaphore, #tpu.memory_space<semaphore_mem>> -> memref<1x1x!tpu.dma_semaphore, #tpu.memory_space<semaphore_mem>>
        %119 = tpu.memref_squeeze %118 : memref<1x1x!tpu.dma_semaphore, #tpu.memory_space<semaphore_mem>> -> memref<!tpu.dma_semaphore, #tpu.memory_space<semaphore_mem>>
        tpu.wait_dma2 semaphore(%119 : memref<!tpu.dma_semaphore, #tpu.memory_space<semaphore_mem>>) src(%115 : memref<1x128xf32, #tpu.memory_space<any>>) dst(%117 : memref<1x128xf32, #tpu.memory_space<vmem>>)
        %c4_i32_98 = arith.constant 4 : i32
        %c0_i32_99 = arith.constant 0 : i32
        %c0_i32_100 = arith.constant 0 : i32
        %120 = tpu.memref_slice %arg3[%c0_i32_99, %c0_i32_100] : memref<256x128xf32, #tpu.memory_space<any>> -> memref<1x128xf32, #tpu.memory_space<any>>
        %c4_i32_101 = arith.constant 4 : i32
        %c0_i32_102 = arith.constant 0 : i32
        %121 = tpu.memref_slice %arg10[%99, %c4_i32_101, %c0_i32_102] : memref<2x8x128xf32, #tpu.memory_space<vmem>> -> memref<1x1x128xf32, #tpu.memory_space<vmem>>
        %122 = tpu.memref_squeeze %121 : memref<1x1x128xf32, #tpu.memory_space<vmem>> -> memref<1x128xf32, #tpu.memory_space<vmem>>
        %123 = tpu.memref_slice %arg11[%99, %c4_i32_98] : memref<2x8x!tpu.dma_semaphore, #tpu.memory_space<semaphore_mem>> -> memref<1x1x!tpu.dma_semaphore, #tpu.memory_space<semaphore_mem>>
        %124 = tpu.memref_squeeze %123 : memref<1x1x!tpu.dma_semaphore, #tpu.memory_space<semaphore_mem>> -> memref<!tpu.dma_semaphore, #tpu.memory_space<semaphore_mem>>
        tpu.wait_dma2 semaphore(%124 : memref<!tpu.dma_semaphore, #tpu.memory_space<semaphore_mem>>) src(%120 : memref<1x128xf32, #tpu.memory_space<any>>) dst(%122 : memref<1x128xf32, #tpu.memory_space<vmem>>)
        %c5_i32_103 = arith.constant 5 : i32
        %c0_i32_104 = arith.constant 0 : i32
        %c0_i32_105 = arith.constant 0 : i32
        %125 = tpu.memref_slice %arg3[%c0_i32_104, %c0_i32_105] : memref<256x128xf32, #tpu.memory_space<any>> -> memref<1x128xf32, #tpu.memory_space<any>>
        %c5_i32_106 = arith.constant 5 : i32
        %c0_i32_107 = arith.constant 0 : i32
        %126 = tpu.memref_slice %arg10[%99, %c5_i32_106, %c0_i32_107] : memref<2x8x128xf32, #tpu.memory_space<vmem>> -> memref<1x1x128xf32, #tpu.memory_space<vmem>>
        %127 = tpu.memref_squeeze %126 : memref<1x1x128xf32, #tpu.memory_space<vmem>> -> memref<1x128xf32, #tpu.memory_space<vmem>>
        %128 = tpu.memref_slice %arg11[%99, %c5_i32_103] : memref<2x8x!tpu.dma_semaphore, #tpu.memory_space<semaphore_mem>> -> memref<1x1x!tpu.dma_semaphore, #tpu.memory_space<semaphore_mem>>
        %129 = tpu.memref_squeeze %128 : memref<1x1x!tpu.dma_semaphore, #tpu.memory_space<semaphore_mem>> -> memref<!tpu.dma_semaphore, #tpu.memory_space<semaphore_mem>>
        tpu.wait_dma2 semaphore(%129 : memref<!tpu.dma_semaphore, #tpu.memory_space<semaphore_mem>>) src(%125 : memref<1x128xf32, #tpu.memory_space<any>>) dst(%127 : memref<1x128xf32, #tpu.memory_space<vmem>>)
        %c6_i32_108 = arith.constant 6 : i32
        %c0_i32_109 = arith.constant 0 : i32
        %c0_i32_110 = arith.constant 0 : i32
        %130 = tpu.memref_slice %arg3[%c0_i32_109, %c0_i32_110] : memref<256x128xf32, #tpu.memory_space<any>> -> memref<1x128xf32, #tpu.memory_space<any>>
        %c6_i32_111 = arith.constant 6 : i32
        %c0_i32_112 = arith.constant 0 : i32
        %131 = tpu.memref_slice %arg10[%99, %c6_i32_111, %c0_i32_112] : memref<2x8x128xf32, #tpu.memory_space<vmem>> -> memref<1x1x128xf32, #tpu.memory_space<vmem>>
        %132 = tpu.memref_squeeze %131 : memref<1x1x128xf32, #tpu.memory_space<vmem>> -> memref<1x128xf32, #tpu.memory_space<vmem>>
        %133 = tpu.memref_slice %arg11[%99, %c6_i32_108] : memref<2x8x!tpu.dma_semaphore, #tpu.memory_space<semaphore_mem>> -> memref<1x1x!tpu.dma_semaphore, #tpu.memory_space<semaphore_mem>>
        %134 = tpu.memref_squeeze %133 : memref<1x1x!tpu.dma_semaphore, #tpu.memory_space<semaphore_mem>> -> memref<!tpu.dma_semaphore, #tpu.memory_space<semaphore_mem>>
        tpu.wait_dma2 semaphore(%134 : memref<!tpu.dma_semaphore, #tpu.memory_space<semaphore_mem>>) src(%130 : memref<1x128xf32, #tpu.memory_space<any>>) dst(%132 : memref<1x128xf32, #tpu.memory_space<vmem>>)
        %c7_i32_113 = arith.constant 7 : i32
        %c0_i32_114 = arith.constant 0 : i32
        %c0_i32_115 = arith.constant 0 : i32
        %135 = tpu.memref_slice %arg3[%c0_i32_114, %c0_i32_115] : memref<256x128xf32, #tpu.memory_space<any>> -> memref<1x128xf32, #tpu.memory_space<any>>
        %c7_i32_116 = arith.constant 7 : i32
        %c0_i32_117 = arith.constant 0 : i32
        %136 = tpu.memref_slice %arg10[%99, %c7_i32_116, %c0_i32_117] : memref<2x8x128xf32, #tpu.memory_space<vmem>> -> memref<1x1x128xf32, #tpu.memory_space<vmem>>
        %137 = tpu.memref_squeeze %136 : memref<1x1x128xf32, #tpu.memory_space<vmem>> -> memref<1x128xf32, #tpu.memory_space<vmem>>
        %138 = tpu.memref_slice %arg11[%99, %c7_i32_113] : memref<2x8x!tpu.dma_semaphore, #tpu.memory_space<semaphore_mem>> -> memref<1x1x!tpu.dma_semaphore, #tpu.memory_space<semaphore_mem>>
        %139 = tpu.memref_squeeze %138 : memref<1x1x!tpu.dma_semaphore, #tpu.memory_space<semaphore_mem>> -> memref<!tpu.dma_semaphore, #tpu.memory_space<semaphore_mem>>
        tpu.wait_dma2 semaphore(%139 : memref<!tpu.dma_semaphore, #tpu.memory_space<semaphore_mem>>) src(%135 : memref<1x128xf32, #tpu.memory_space<any>>) dst(%137 : memref<1x128xf32, #tpu.memory_space<vmem>>)
        %c1_i32_118 = arith.constant 1 : i32
        %140 = arith.addi %arg12, %c1_i32_118 : i32
        %c8_i32_119 = arith.constant 8 : i32
        %141 = arith.cmpi slt, %140, %c8_i32_119 : i32
        %142 = arith.extui %141 : i1 to i32
        %c0_i32_120 = arith.constant 0 : i32
        %143 = arith.cmpi ne, %142, %c0_i32_120 : i32
        scf.if %143 {
          %c1_i32_125 = arith.constant 1 : i32
          %151 = arith.addi %arg12, %c1_i32_125 : i32
          %c1_i32_126 = arith.constant 1 : i32
          %152 = arith.subi %c1_i32_126, %99 : i32
          %c8_i32_127 = arith.constant 8 : i32
          %153 = arith.muli %arg0, %c8_i32_127 : i32
          %154 = arith.addi %153, %151 : i32
          %155 = arith.index_cast %154 : i32 to index
          %c0_128 = arith.constant 0 : index
          %156 = memref.load %arg2[%155, %c0_128] : memref<16x8xi32, #tpu.memory_space<smem>>
          %c0_i32_129 = arith.constant 0 : i32
          %c0_i32_130 = arith.constant 0 : i32
          %157 = tpu.memref_slice %arg3[%156, %c0_i32_130] : memref<256x128xf32, #tpu.memory_space<any>> -> memref<1x128xf32, #tpu.memory_space<any>>
          %c0_i32_131 = arith.constant 0 : i32
          %c0_i32_132 = arith.constant 0 : i32
          %158 = tpu.memref_slice %arg10[%152, %c0_i32_131, %c0_i32_132] : memref<2x8x128xf32, #tpu.memory_space<vmem>> -> memref<1x1x128xf32, #tpu.memory_space<vmem>>
          %159 = tpu.memref_squeeze %158 : memref<1x1x128xf32, #tpu.memory_space<vmem>> -> memref<1x128xf32, #tpu.memory_space<vmem>>
          %160 = tpu.memref_slice %arg11[%152, %c0_i32_129] : memref<2x8x!tpu.dma_semaphore, #tpu.memory_space<semaphore_mem>> -> memref<1x1x!tpu.dma_semaphore, #tpu.memory_space<semaphore_mem>>
          %161 = tpu.memref_squeeze %160 : memref<1x1x!tpu.dma_semaphore, #tpu.memory_space<semaphore_mem>> -> memref<!tpu.dma_semaphore, #tpu.memory_space<semaphore_mem>>
          tpu.enqueue_dma source(%157 : memref<1x128xf32, #tpu.memory_space<any>>) target(%159 : memref<1x128xf32, #tpu.memory_space<vmem>>) target_semaphore(%161 : memref<!tpu.dma_semaphore, #tpu.memory_space<semaphore_mem>>)
          %162 = arith.index_cast %154 : i32 to index
          %c1_133 = arith.constant 1 : index
          %163 = memref.load %arg2[%162, %c1_133] : memref<16x8xi32, #tpu.memory_space<smem>>
          %c1_i32_134 = arith.constant 1 : i32
          %c0_i32_135 = arith.constant 0 : i32
          %164 = tpu.memref_slice %arg3[%163, %c0_i32_135] : memref<256x128xf32, #tpu.memory_space<any>> -> memref<1x128xf32, #tpu.memory_space<any>>
          %c1_i32_136 = arith.constant 1 : i32
          %c0_i32_137 = arith.constant 0 : i32
          %165 = tpu.memref_slice %arg10[%152, %c1_i32_136, %c0_i32_137] : memref<2x8x128xf32, #tpu.memory_space<vmem>> -> memref<1x1x128xf32, #tpu.memory_space<vmem>>
          %166 = tpu.memref_squeeze %165 : memref<1x1x128xf32, #tpu.memory_space<vmem>> -> memref<1x128xf32, #tpu.memory_space<vmem>>
          %167 = tpu.memref_slice %arg11[%152, %c1_i32_134] : memref<2x8x!tpu.dma_semaphore, #tpu.memory_space<semaphore_mem>> -> memref<1x1x!tpu.dma_semaphore, #tpu.memory_space<semaphore_mem>>
          %168 = tpu.memref_squeeze %167 : memref<1x1x!tpu.dma_semaphore, #tpu.memory_space<semaphore_mem>> -> memref<!tpu.dma_semaphore, #tpu.memory_space<semaphore_mem>>
          tpu.enqueue_dma source(%164 : memref<1x128xf32, #tpu.memory_space<any>>) target(%166 : memref<1x128xf32, #tpu.memory_space<vmem>>) target_semaphore(%168 : memref<!tpu.dma_semaphore, #tpu.memory_space<semaphore_mem>>)
          %169 = arith.index_cast %154 : i32 to index
          %c2_138 = arith.constant 2 : index
          %170 = memref.load %arg2[%169, %c2_138] : memref<16x8xi32, #tpu.memory_space<smem>>
          %c2_i32_139 = arith.constant 2 : i32
          %c0_i32_140 = arith.constant 0 : i32
          %171 = tpu.memref_slice %arg3[%170, %c0_i32_140] : memref<256x128xf32, #tpu.memory_space<any>> -> memref<1x128xf32, #tpu.memory_space<any>>
          %c2_i32_141 = arith.constant 2 : i32
          %c0_i32_142 = arith.constant 0 : i32
          %172 = tpu.memref_slice %arg10[%152, %c2_i32_141, %c0_i32_142] : memref<2x8x128xf32, #tpu.memory_space<vmem>> -> memref<1x1x128xf32, #tpu.memory_space<vmem>>
          %173 = tpu.memref_squeeze %172 : memref<1x1x128xf32, #tpu.memory_space<vmem>> -> memref<1x128xf32, #tpu.memory_space<vmem>>
          %174 = tpu.memref_slice %arg11[%152, %c2_i32_139] : memref<2x8x!tpu.dma_semaphore, #tpu.memory_space<semaphore_mem>> -> memref<1x1x!tpu.dma_semaphore, #tpu.memory_space<semaphore_mem>>
          %175 = tpu.memref_squeeze %174 : memref<1x1x!tpu.dma_semaphore, #tpu.memory_space<semaphore_mem>> -> memref<!tpu.dma_semaphore, #tpu.memory_space<semaphore_mem>>
          tpu.enqueue_dma source(%171 : memref<1x128xf32, #tpu.memory_space<any>>) target(%173 : memref<1x128xf32, #tpu.memory_space<vmem>>) target_semaphore(%175 : memref<!tpu.dma_semaphore, #tpu.memory_space<semaphore_mem>>)
          %176 = arith.index_cast %154 : i32 to index
          %c3_143 = arith.constant 3 : index
          %177 = memref.load %arg2[%176, %c3_143] : memref<16x8xi32, #tpu.memory_space<smem>>
          %c3_i32_144 = arith.constant 3 : i32
          %c0_i32_145 = arith.constant 0 : i32
          %178 = tpu.memref_slice %arg3[%177, %c0_i32_145] : memref<256x128xf32, #tpu.memory_space<any>> -> memref<1x128xf32, #tpu.memory_space<any>>
          %c3_i32_146 = arith.constant 3 : i32
          %c0_i32_147 = arith.constant 0 : i32
          %179 = tpu.memref_slice %arg10[%152, %c3_i32_146, %c0_i32_147] : memref<2x8x128xf32, #tpu.memory_space<vmem>> -> memref<1x1x128xf32, #tpu.memory_space<vmem>>
          %180 = tpu.memref_squeeze %179 : memref<1x1x128xf32, #tpu.memory_space<vmem>> -> memref<1x128xf32, #tpu.memory_space<vmem>>
          %181 = tpu.memref_slice %arg11[%152, %c3_i32_144] : memref<2x8x!tpu.dma_semaphore, #tpu.memory_space<semaphore_mem>> -> memref<1x1x!tpu.dma_semaphore, #tpu.memory_space<semaphore_mem>>
          %182 = tpu.memref_squeeze %181 : memref<1x1x!tpu.dma_semaphore, #tpu.memory_space<semaphore_mem>> -> memref<!tpu.dma_semaphore, #tpu.memory_space<semaphore_mem>>
          tpu.enqueue_dma source(%178 : memref<1x128xf32, #tpu.memory_space<any>>) target(%180 : memref<1x128xf32, #tpu.memory_space<vmem>>) target_semaphore(%182 : memref<!tpu.dma_semaphore, #tpu.memory_space<semaphore_mem>>)
          %183 = arith.index_cast %154 : i32 to index
          %c4_148 = arith.constant 4 : index
          %184 = memref.load %arg2[%183, %c4_148] : memref<16x8xi32, #tpu.memory_space<smem>>
          %c4_i32_149 = arith.constant 4 : i32
          %c0_i32_150 = arith.constant 0 : i32
          %185 = tpu.memref_slice %arg3[%184, %c0_i32_150] : memref<256x128xf32, #tpu.memory_space<any>> -> memref<1x128xf32, #tpu.memory_space<any>>
          %c4_i32_151 = arith.constant 4 : i32
          %c0_i32_152 = arith.constant 0 : i32
          %186 = tpu.memref_slice %arg10[%152, %c4_i32_151, %c0_i32_152] : memref<2x8x128xf32, #tpu.memory_space<vmem>> -> memref<1x1x128xf32, #tpu.memory_space<vmem>>
          %187 = tpu.memref_squeeze %186 : memref<1x1x128xf32, #tpu.memory_space<vmem>> -> memref<1x128xf32, #tpu.memory_space<vmem>>
          %188 = tpu.memref_slice %arg11[%152, %c4_i32_149] : memref<2x8x!tpu.dma_semaphore, #tpu.memory_space<semaphore_mem>> -> memref<1x1x!tpu.dma_semaphore, #tpu.memory_space<semaphore_mem>>
          %189 = tpu.memref_squeeze %188 : memref<1x1x!tpu.dma_semaphore, #tpu.memory_space<semaphore_mem>> -> memref<!tpu.dma_semaphore, #tpu.memory_space<semaphore_mem>>
          tpu.enqueue_dma source(%185 : memref<1x128xf32, #tpu.memory_space<any>>) target(%187 : memref<1x128xf32, #tpu.memory_space<vmem>>) target_semaphore(%189 : memref<!tpu.dma_semaphore, #tpu.memory_space<semaphore_mem>>)
          %190 = arith.index_cast %154 : i32 to index
          %c5_153 = arith.constant 5 : index
          %191 = memref.load %arg2[%190, %c5_153] : memref<16x8xi32, #tpu.memory_space<smem>>
          %c5_i32_154 = arith.constant 5 : i32
          %c0_i32_155 = arith.constant 0 : i32
          %192 = tpu.memref_slice %arg3[%191, %c0_i32_155] : memref<256x128xf32, #tpu.memory_space<any>> -> memref<1x128xf32, #tpu.memory_space<any>>
          %c5_i32_156 = arith.constant 5 : i32
          %c0_i32_157 = arith.constant 0 : i32
          %193 = tpu.memref_slice %arg10[%152, %c5_i32_156, %c0_i32_157] : memref<2x8x128xf32, #tpu.memory_space<vmem>> -> memref<1x1x128xf32, #tpu.memory_space<vmem>>
          %194 = tpu.memref_squeeze %193 : memref<1x1x128xf32, #tpu.memory_space<vmem>> -> memref<1x128xf32, #tpu.memory_space<vmem>>
          %195 = tpu.memref_slice %arg11[%152, %c5_i32_154] : memref<2x8x!tpu.dma_semaphore, #tpu.memory_space<semaphore_mem>> -> memref<1x1x!tpu.dma_semaphore, #tpu.memory_space<semaphore_mem>>
          %196 = tpu.memref_squeeze %195 : memref<1x1x!tpu.dma_semaphore, #tpu.memory_space<semaphore_mem>> -> memref<!tpu.dma_semaphore, #tpu.memory_space<semaphore_mem>>
          tpu.enqueue_dma source(%192 : memref<1x128xf32, #tpu.memory_space<any>>) target(%194 : memref<1x128xf32, #tpu.memory_space<vmem>>) target_semaphore(%196 : memref<!tpu.dma_semaphore, #tpu.memory_space<semaphore_mem>>)
          %197 = arith.index_cast %154 : i32 to index
          %c6_158 = arith.constant 6 : index
          %198 = memref.load %arg2[%197, %c6_158] : memref<16x8xi32, #tpu.memory_space<smem>>
          %c6_i32_159 = arith.constant 6 : i32
          %c0_i32_160 = arith.constant 0 : i32
          %199 = tpu.memref_slice %arg3[%198, %c0_i32_160] : memref<256x128xf32, #tpu.memory_space<any>> -> memref<1x128xf32, #tpu.memory_space<any>>
          %c6_i32_161 = arith.constant 6 : i32
          %c0_i32_162 = arith.constant 0 : i32
          %200 = tpu.memref_slice %arg10[%152, %c6_i32_161, %c0_i32_162] : memref<2x8x128xf32, #tpu.memory_space<vmem>> -> memref<1x1x128xf32, #tpu.memory_space<vmem>>
          %201 = tpu.memref_squeeze %200 : memref<1x1x128xf32, #tpu.memory_space<vmem>> -> memref<1x128xf32, #tpu.memory_space<vmem>>
          %202 = tpu.memref_slice %arg11[%152, %c6_i32_159] : memref<2x8x!tpu.dma_semaphore, #tpu.memory_space<semaphore_mem>> -> memref<1x1x!tpu.dma_semaphore, #tpu.memory_space<semaphore_mem>>
          %203 = tpu.memref_squeeze %202 : memref<1x1x!tpu.dma_semaphore, #tpu.memory_space<semaphore_mem>> -> memref<!tpu.dma_semaphore, #tpu.memory_space<semaphore_mem>>
          tpu.enqueue_dma source(%199 : memref<1x128xf32, #tpu.memory_space<any>>) target(%201 : memref<1x128xf32, #tpu.memory_space<vmem>>) target_semaphore(%203 : memref<!tpu.dma_semaphore, #tpu.memory_space<semaphore_mem>>)
          %204 = arith.index_cast %154 : i32 to index
          %c7_163 = arith.constant 7 : index
          %205 = memref.load %arg2[%204, %c7_163] : memref<16x8xi32, #tpu.memory_space<smem>>
          %c7_i32_164 = arith.constant 7 : i32
          %c0_i32_165 = arith.constant 0 : i32
          %206 = tpu.memref_slice %arg3[%205, %c0_i32_165] : memref<256x128xf32, #tpu.memory_space<any>> -> memref<1x128xf32, #tpu.memory_space<any>>
          %c7_i32_166 = arith.constant 7 : i32
          %c0_i32_167 = arith.constant 0 : i32
          %207 = tpu.memref_slice %arg10[%152, %c7_i32_166, %c0_i32_167] : memref<2x8x128xf32, #tpu.memory_space<vmem>> -> memref<1x1x128xf32, #tpu.memory_space<vmem>>
          %208 = tpu.memref_squeeze %207 : memref<1x1x128xf32, #tpu.memory_space<vmem>> -> memref<1x128xf32, #tpu.memory_space<vmem>>
          %209 = tpu.memref_slice %arg11[%152, %c7_i32_164] : memref<2x8x!tpu.dma_semaphore, #tpu.memory_space<semaphore_mem>> -> memref<1x1x!tpu.dma_semaphore, #tpu.memory_space<semaphore_mem>>
          %210 = tpu.memref_squeeze %209 : memref<1x1x!tpu.dma_semaphore, #tpu.memory_space<semaphore_mem>> -> memref<!tpu.dma_semaphore, #tpu.memory_space<semaphore_mem>>
          tpu.enqueue_dma source(%206 : memref<1x128xf32, #tpu.memory_space<any>>) target(%208 : memref<1x128xf32, #tpu.memory_space<vmem>>) target_semaphore(%210 : memref<!tpu.dma_semaphore, #tpu.memory_space<semaphore_mem>>)
        } else {
        }
        %144 = arith.index_cast %99 : i32 to index
        %c0_121 = arith.constant 0 : index
        %c0_122 = arith.constant 0 : index
        %145 = vector.load %arg10[%144, %c0_121, %c0_122] : memref<2x8x128xf32, #tpu.memory_space<vmem>>, vector<1x8x128xf32>
        %146 = vector.shape_cast %145 : vector<1x8x128xf32> to vector<8x128xf32>
        %cst_123 = arith.constant dense<0.000000e+00> : vector<128xf32>
        %147 = vector.multi_reduction <add>, %146, %cst_123 [0] : vector<8x128xf32> to vector<128xf32>
        %148 = vector.shape_cast %147 : vector<128xf32> to vector<1x128xf32>
        %149 = arith.index_cast %arg12 : i32 to index
        %c0_124 = arith.constant 0 : index
        %150 = vector.load %arg7[%149, %c0_124] : memref<8x128xf32, #tpu.memory_space<vmem>>, vector<1x128xf32>
        tpu.vector_store %arg7[%149, %c0_124], %148 {strides = array<i32>} : memref<8x128xf32, #tpu.memory_space<vmem>>, vector<1x128xf32>,
      }
      %c8_i32_65 = arith.constant 8 : i32
      %c0_66 = arith.constant 0 : index
      %c0_67 = arith.constant 0 : index
      %91 = vector.load %arg7[%c0_66, %c0_67] : memref<8x128xf32, #tpu.memory_space<vmem>>, vector<8x128xf32>
      %cst_68 = arith.constant 1.250000e-01 : f32
      %92 = vector.broadcast %cst_68 : f32 to vector<8x128xf32>
      %93 = arith.mulf %91, %92 : vector<8x128xf32>
      %c0_69 = arith.constant 0 : index
      %c0_70 = arith.constant 0 : index
      %94 = vector.load %arg7[%c0_69, %c0_70] : memref<8x128xf32, #tpu.memory_space<vmem>>, vector<8x128xf32>
      tpu.vector_store %arg7[%c0_69, %c0_70], %93 {strides = array<i32>} : memref<8x128xf32, #tpu.memory_space<vmem>>, vector<8x128xf32>,
      %cst_71 = arith.constant 0xFF800000 : f32
      %95 = vector.broadcast %cst_71 : f32 to vector<8x1xf32>
      %c0_72 = arith.constant 0 : index
      %c0_73 = arith.constant 0 : index
      %96 = vector.load %arg8[%c0_72, %c0_73] : memref<8x1xf32, #tpu.memory_space<vmem>>, vector<8x1xf32>
      tpu.vector_store %arg8[%c0_72, %c0_73], %95 {strides = array<i32>} : memref<8x1xf32, #tpu.memory_space<vmem>>, vector<8x1xf32>,
      %cst_74 = arith.constant 0.000000e+00 : f32
      %97 = vector.broadcast %cst_74 : f32 to vector<8x1xf32>
      %c0_75 = arith.constant 0 : index
      %c0_76 = arith.constant 0 : index
      %98 = vector.load %arg9[%c0_75, %c0_76] : memref<8x1xf32, #tpu.memory_space<vmem>>, vector<8x1xf32>
      tpu.vector_store %arg9[%c0_75, %c0_76], %97 {strides = array<i32>} : memref<8x1xf32, #tpu.memory_space<vmem>>, vector<8x1xf32>,
    } else {
    }
    %c0 = arith.constant 0 : index
    %c0_1 = arith.constant 0 : index
    %3 = vector.load %arg7[%c0, %c0_1] : memref<8x128xf32, #tpu.memory_space<vmem>>, vector<8x128xf32>
    %c0_2 = arith.constant 0 : index
    %c0_3 = arith.constant 0 : index
    %4 = vector.load %arg4[%c0_2, %c0_3] : memref<128x128xf32, #tpu.memory_space<vmem>>, vector<128x128xf32>
    %cst = arith.constant dense<0.000000e+00> : vector<8x128xf32>
    %5 = tpu.matmul %3, %4, %cst {dimension_numbers = #tpu.dot_dimension_numbers<[1], [1], [0], [0], [0, 0, 1, 0], [], []>} : vector<8x128xf32>, vector<128x128xf32>, vector<8x128xf32> -> vector<8x128xf32>
    %c0_4 = arith.constant 0 : index
    %c0_5 = arith.constant 0 : index
    %6 = vector.load %arg5[%c0_4, %c0_5] : memref<1x128xf32, #tpu.memory_space<vmem>>, vector<1x128xf32>
    %7 = vector.broadcast %6 : vector<1x128xf32> to vector<8x128xf32>
    %8 = arith.addf %5, %7 : vector<8x128xf32>
    %c0_6 = arith.constant 0 : index
    %c0_7 = arith.constant 0 : index
    %9 = vector.load %arg8[%c0_6, %c0_7] : memref<8x1xf32, #tpu.memory_space<vmem>>, vector<8x1xf32>
    %cst_8 = arith.constant dense<0xFF800000> : vector<8xf32>
    %10 = vector.multi_reduction <maximumf>, %8, %cst_8 [1] : vector<8x128xf32> to vector<8xf32>
    %11 = vector.shape_cast %10 : vector<8xf32> to vector<8x1xf32>
    %12 = arith.maximumf %9, %11 : vector<8x1xf32>
    %c0_9 = arith.constant 0 : index
    %c0_10 = arith.constant 0 : index
    %13 = vector.load %arg9[%c0_9, %c0_10] : memref<8x1xf32, #tpu.memory_space<vmem>>, vector<8x1xf32>
    %14 = arith.subf %9, %12 : vector<8x1xf32>
    %15 = math.exp %14 : vector<8x1xf32>
    %16 = arith.mulf %13, %15 : vector<8x1xf32>
    %17 = vector.broadcast %12 : vector<8x1xf32> to vector<8x128xf32>
    %18 = arith.subf %8, %17 : vector<8x128xf32>
    %19 = math.exp %18 : vector<8x128xf32>
    %cst_11 = arith.constant dense<0.000000e+00> : vector<8xf32>
    %20 = vector.multi_reduction <add>, %19, %cst_11 [1] : vector<8x128xf32> to vector<8xf32>
    %21 = vector.shape_cast %20 : vector<8xf32> to vector<8x1xf32>
    %22 = arith.addf %16, %21 : vector<8x1xf32>
    %c0_12 = arith.constant 0 : index
    %c0_13 = arith.constant 0 : index
    %23 = vector.load %arg9[%c0_12, %c0_13] : memref<8x1xf32, #tpu.memory_space<vmem>>, vector<8x1xf32>
    tpu.vector_store %arg9[%c0_12, %c0_13], %22 {strides = array<i32>} : memref<8x1xf32, #tpu.memory_space<vmem>>, vector<8x1xf32>,
    %c0_14 = arith.constant 0 : index
    %c0_15 = arith.constant 0 : index
    %24 = vector.load %arg8[%c0_14, %c0_15] : memref<8x1xf32, #tpu.memory_space<vmem>>, vector<8x1xf32>
    tpu.vector_store %arg8[%c0_14, %c0_15], %12 {strides = array<i32>} : memref<8x1xf32, #tpu.memory_space<vmem>>, vector<8x1xf32>,
    %c128_i32 = arith.constant 128 : i32
    %25 = arith.muli %arg1, %c128_i32 : i32
    %26 = tpu.assume_multiple %25, 128 : i32
    %c0_16 = arith.constant 0 : index
    %27 = arith.index_cast %26 : i32 to index
    %28 = vector.load %arg6[%c0_16, %27] : memref<8x256xf32, #tpu.memory_space<vmem>>, vector<8x128xf32>
    tpu.vector_store %arg6[%c0_16, %27], %8 {strides = array<i32>} : memref<8x256xf32, #tpu.memory_space<vmem>>, vector<8x128xf32>,
    %c1_i32 = arith.constant 1 : i32
    %29 = arith.cmpi eq, %arg1, %c1_i32 : i32
    %30 = arith.extui %29 : i1 to i32
    %c0_i32_17 = arith.constant 0 : i32
    %31 = arith.cmpi ne, %30, %c0_i32_17 : i32
    scf.if %31 {
      %c0_18 = arith.constant 0 : index
      %c0_19 = arith.constant 0 : index
      %32 = vector.load %arg8[%c0_18, %c0_19] : memref<8x1xf32, #tpu.memory_space<vmem>>, vector<8x1xf32>
      %c0_20 = arith.constant 0 : index
      %c0_21 = arith.constant 0 : index
      %33 = vector.load %arg9[%c0_20, %c0_21] : memref<8x1xf32, #tpu.memory_space<vmem>>, vector<8x1xf32>
      %34 = math.log %33 : vector<8x1xf32>
      %35 = arith.addf %32, %34 : vector<8x1xf32>
      %c0_22 = arith.constant 0 : index
      %c0_23 = arith.constant 0 : index
      %36 = vector.load %arg6[%c0_22, %c0_23] : memref<8x256xf32, #tpu.memory_space<vmem>>, vector<8x256xf32>
      %37 = vector.broadcast %35 : vector<8x1xf32> to vector<8x256xf32>
      %38 = arith.subf %36, %37 : vector<8x256xf32>
      %c0_24 = arith.constant 0 : index
      %c0_25 = arith.constant 0 : index
      %39 = vector.load %arg6[%c0_24, %c0_25] : memref<8x256xf32, #tpu.memory_space<vmem>>, vector<8x256xf32>
      tpu.vector_store %arg6[%c0_24, %c0_25], %38 {strides = array<i32>} : memref<8x256xf32, #tpu.memory_space<vmem>>, vector<8x256xf32>,
    } else {
    }
    return
  }
  func.func @transform_1(%arg0: i32, %arg1: i32, %arg2: memref<16x8xi32, #tpu.memory_space<smem>>) -> (i32, i32) {
    %c0_i32 = arith.constant 0 : i32
    %c0_i32_0 = arith.constant 0 : i32
    return %arg1, %c0_i32 : i32, i32
  }
  func.func @transform_2(%arg0: i32, %arg1: i32, %arg2: memref<16x8xi32, #tpu.memory_space<smem>>) -> (i32, i32) {
    %c0_i32 = arith.constant 0 : i32
    %c0_i32_0 = arith.constant 0 : i32
    return %c0_i32, %arg1 : i32, i32
  }
  func.func @transform_3(%arg0: i32, %arg1: i32, %arg2: memref<16x8xi32, #tpu.memory_space<smem>>) -> (i32, i32) {
    %c0_i32 = arith.constant 0 : i32
    %c0_i32_0 = arith.constant 0 : i32
    return %arg0, %c0_i32 : i32, i32
  }
}

</mosaic_0001>

<bundles_post_ra>
// kernel: tpu_custom_call.1
= control target key start
LH: loop header
LB: loop body
LE: loop exit
PB: predicated region body
PF: predicated region fallthrough
CT: control target
= control target key end

     0   :  { %s2507_s0 = inlined_call_operand.vmem [shape: s32[16,8], index: 0, kind: input, shape index: {}]   ;;  %s2508_s1 = inlined_call_operand.hbm [shape: f32[256,128], index: 1, kind: input, shape index: {}]   ;;  %s2509_s2 = inlined_call_operand.hbm [shape: f32[256,128], index: 2, kind: input, shape index: {}]   ;;  %s2510_s3 = inlined_call_operand.vmem [shape: f32[1,256], index: 3, kind: input, shape index: {}]   ;;  %s2511_s4 = inlined_call_operand.hbm [shape: f32[16,256], index: 4, kind: output, shape index: {}]  }
   0x1   :  { %2529 = sst [smem:[#allocation81_spill]] %s2509_s2  ;;  %s9_s17 = sshll.u32 %s2507_s0, 4  ;;  %s10_s17 = int_to_ptr.vmem [resolvable:$true] %s9_s17 }
   0x2   :  { %2530 = sst [smem:[#allocation82_spill]] %s2511_s4  ;;  %s1308_s18 = scalar_lea.vmem %s10_s17, 256 }
   0x3   :  { %p1309_p0 = scmp.ne.s32.totalorder %s10_s17, %s1308_s18  ;;  %p1313_p1 = scmp.lt.s32.totalorder %s10_s17, %s10_s17 }
   0x4   :  { %p1314_p2 = scmp.lt.s32.totalorder %s1308_s18, %s1308_s18 }
   0x6   :  { %p1315_p3 = por %p1314_p2, %p1313_p1 }
   0x8   :  { %p1316_p4 = pnand %p1315_p3, %p1309_p0 }
   0xa   :  { %1319 = shalt.err (!%p1316_p4)  }
   0xb   :  { %s1880_s19 = smov [#allocation8]  }
   0xc   :  { %12 = dma.vmem_to_smem %s10_s17, 256, %s1880_s19, [#allocation7] }
   0xd   :  { %1806 = dma.done.wait [#allocation7], 256 }
   0xe   :  { %1807 = vsyncadd [#allocation7], 4294967040 }
   0xf   :  { %14 = sfence }
  0x10   :  { %15 = vsyncpa [#allocation10], 0 }
  0x11   :  { %17 = vsyncpa [#allocation10 + $0x1], 0 }
  0x12   :  { %18 = vsyncpa [#allocation11], 0 }
  0x13   :  { %20 = vsyncpa [#allocation11 + $0x1], 0  ;;  %s1927_s20 = smov 0   ;;  %s1929_s0 = smov 0  }
  0x14   :  { %s1931_s21 = smov 0   ;;  %s1933_s22 = smov 0  }
  0x15   :  { %s1935_s23 = smov 0   ;;  %s1937_s24 = smov 0  }
  0x16   :  { %s1939_s25 = smov 0   ;;  %s1941_s26 = smov 0  }
  0x17   :  { %s1943_s27 = smov 0   ;;  %s1945_s28 = smov 0  }
  0x18   :  { %s1947_s29 = smov 0  }
  0x19 LB: > { %2531 = sst [smem:[#allocation66_spill]] %s1834_s20  ;;  %s1013_s30 = sadd.s32 4294967295, %s1874_s29   ;;  %s1874_s29 = sphi %s1947_s29, %s26_s29   ;;  %s1870_s28 = sphi %s1945_s28, %s2576_s28   ;;  %s1866_s27 = sphi %s1943_s27, %s2575_s27   ;;  %s1862_s26 = sphi %s1941_s26, %s2574_s26   ;;  %s1858_s25 = sphi %s1939_s25, %s2573_s25   ;;  %s1854_s24 = sphi %s1937_s24, %s2572_s24   ;;  %s1850_s23 = sphi %s1935_s23, %s2571_s23   ;;  %s1846_s22 = sphi %s1933_s22, %s2570_s22   ;;  %s1842_s21 = sphi %s1931_s21, %s2569_s21   ;;  %s1838_s0 = sphi %s1929_s0, %s2568_s0   ;;  %s1834_s20 = sphi %s1927_s20, %s2567_s20  }
  0x1a   : > { %2532 = sst [smem:[#allocation67_spill]] %s1838_s0  ;;  %s1014_s5 = sadd.s32 4294967294, %s1874_s29  }
  0x1b   : > { %2533 = sst [smem:[#allocation68_spill]] %s1842_s21  ;;  %s35_s6 = sadd.s32 1, %s1866_s27 }
  0x1c   : > { %2534 = sst [smem:[#allocation69_spill]] %s1850_s23  ;;  %s38_s7 = sadd.s32 1, %s1870_s28 }
  0x1d   : > { %2535 = sst [smem:[#allocation70_spill]] %s1854_s24  ;;  %p36_p5 = scmp.ge.s32.totalorder %s35_s6, 2 }
  0x1e   : > { %2536 = sst [smem:[#allocation71_spill]] %s1862_s26  ;;  %s45_s8 = sadd.s32 1, %s1854_s24 }
  0x1f   : > { %2537 = sst [smem:[#allocation72_spill]] %s1866_s27  ;;  %p52_p6 = scmp.ne.s32.totalorder %s1854_s24, %s1850_s23 }
  0x20   : > { %2538 = sst [smem:[#allocation73_spill]] %s1870_s28  ;;  %p53_p7 = scmp.eq.s32.totalorder %s1874_s29, 0 }
  0x21   : > { %2539 = sst [smem:[#allocation74_spill]] %s1874_s29  ;;  %s2578_s6 = smov (%p36_p5, %s35_s6), 0 }
  0x22   : > { %2540 = sst [smem:[#allocation75_spill]] %s2578_s6  ;;  %s2580_s7 = smov (!%p36_p5, %s38_s7), %s1870_s28 }
  0x23   : > { %s42_s9 = ssub.s32 %s1866_s27, %s2578_s6  ;;  %p1993_p8 = por %p53_p7, %p52_p6 }
  0x24   : > { %p40_p9 = scmp.ge.s32.totalorder %s2580_s7, 2  ;;  %p43_p10 = scmp.eq.s32.totalorder %s42_s9, 0 }
  0x25   : > { %p58_p11 = scmp.ne.s32.totalorder %s1850_s23, %s1846_s22  ;;  %p59_p12 = scmp.eq.s32.totalorder %s1013_s30, 0 }
  0x26   : > { %s2582_s7 = smov (%p40_p9, %s2580_s7), 0  ;;  %s97_s14 = sadd.s32 1, %s1842_s21 }
  0x27   : > { %2542 = sst [smem:[#allocation76_spill]] %s2582_s7  ;;  %p2003_p13 = por %p59_p12, %p58_p11 }
  0x28   : > { %s2001_s11 = scalar_select %p43_p10, %s1854_s24, %s45_s8  }
  0x29   : > { %s94_s13 = ssub.s32 %s1870_s28, %s2582_s7  ;;  %p107_p1 = scmp.ne.s32.totalorder %s1842_s21, %s1838_s0 }
  0x2a   : > { %2543 = sst [smem:[#allocation77_spill]] %s2001_s11  ;;  %p95_p0 = scmp.eq.s32.totalorder %s94_s13, 0 }
  0x2b   : > { %p108_p2 = scmp.eq.s32.totalorder %s1013_s30, 3  ;;  %p113_p4 = scmp.ne.s32.totalorder %s1838_s0, %s1834_s20 }
  0x2c   : > { %s2013_s15 = scalar_select %p95_p0, %s1842_s21, %s97_s14  }
  0x2d   : > { %p2015_p3 = por %p108_p2, %p107_p1  ;;  %p114_p5 = scmp.eq.s32.totalorder %s1014_s5, 3 }
  0x2e   : > { %2545 = sst [smem:[#allocation78_spill]] %s2013_s15  ;;  %p1184_p6 = scmp.lt.s32.totalorder %s1874_s29, 4 }
  0x2f   : > { %s2546_s16 = scalar_select %p2015_p3, 1, 0 }
  0x30   : > { %s134_s17 = sand.u32 1, %s1854_s24   ;;  %p2023_p7 = por %p114_p5, %p113_p4 }
  0x31   : > { %2547 = sst [smem:[#allocation79_spill]] %s2546_s16  ;;  %s1017_s19 = sshll.u32 %s134_s17, 7 }
  0x32   : > { %s2548_s18 = scalar_select %p2023_p7, 1, 0 }
  0x33   : > { %s1092_s22 = sshll.u32 %s1866_s27, 11  ;;  %s2550_s2 = sld [smem:[#allocation81_spill]] }
  0x34   : > { %2549 = sst [smem:[#allocation80_spill]] %s2548_s18  ;;  %s138_s13 = scalar_lea.vmem [#allocation9], %s1017_s19 }
  0x35   : > { %s145_s14 = sshll.u32 %s138_s13, 4  ;;  %p2033_p9 = pnand %p1184_p6, %p1993_p8  ;;  %s146_s14 = int_to_ptr.vmem [resolvable:$true] %s145_s14 }
  0x36   : > { %s135_s5 = scalar_lea.sflag [#allocation10], %s134_s17  ;;  %s1333_s6 = scalar_lea.vmem %s146_s14, 2048 }
  0x37   : > { %p1322_p10 = pneg %p2033_p9  ;;  %p1334_p11 = scmp.ne.s32.totalorder %s146_s14, %s1333_s6 }
  0x38   : > { %s1881_s28 = smov [#allocation9]  }
  0x39   : > { %s144_s30 = scalar_lea.hbm %s2550_s2, %s1092_s22  ;;  %p1336_p12 = pnand %p1334_p11, %p1322_p10 }
  0x3a   : > { %s1338_s27 = sshll.u32 %s1881_s28, 4  ;;  %s1339_s27 = int_to_ptr.vmem [resolvable:$false] %s1338_s27 }
  0x3b   : > { %p1337_p0 = pneg %p1336_p12  ;;  %s1340_s22 = scalar_lea.vmem %s1339_s27, 4096 }
  0x3c   : > { %p1341_p1 = scmp.lt.s32.totalorder %s146_s14, %s1339_s27  ;;  %p1342_p2 = scmp.lt.s32.totalorder %s1340_s22, %s1333_s6 }
  0x3e   : > { %p1343_p4 = por %p1342_p2, %p1341_p1 }
  0x40   : > { %p1344_p8 = pnand %p1343_p4, %p1337_p0 }
  0x42   : > { %1347 = shalt.err (!%p1344_p8)
}
  0x43   : > { %s1882_s10 = smov 128   ;;  %s1883_s17 = smov 8  }
  0x44   : > { %1179 = dma.hbm_to_vmem [thread:$0]  (!%p2033_p9), %s144_s30, 2048, %s146_s14, %s135_s5, %s1882_s10, %s1882_s10, %s1883_s17  }
  0x45   : > { %p1020_p5 = scmp.ge.s32.totalorder %s1874_s29, 1  ;;  %p159_p6 = scmp.lt.s32.totalorder %s1874_s29, 5 }
  0x47   : > { %p160_p10 = pnand %p1020_p5, %p159_p6 }
  0x48   : > { %s165_s28 = sand.u32 (!%p160_p10), 1, %s1850_s23  }
  0x49   : > { %163 = sbr.rel (%p160_p10) target bundleno = 1369 (0x559), region = 28  ;;  %s1021_s19 = sshll.u32 (!%p160_p10), %s165_s28, 7 }
  0x4a   : > { %s166_s27 = scalar_lea.sflag (!%p160_p10), [#allocation10], %s165_s28  ;;  %s2044_s6 = scalar_lea.vmem (!%p160_p10), [#allocation9], %s1021_s19 }
  0x4e   : > { %1809 = dma.done.wait (%p2003_p13), %s166_s27, 2048  }
  0x4f   : > { %1811 = vsyncadd (%p2003_p13), %s166_s27, 4294965248  ;;  %s2516_s7 = sand.u32 1, %s1838_s0   ;;  %p194_p9 = scmp.lt.s32.totalorder %s1858_s25, 1 }
  0x50   : > { %s1022_s8 = sshll.u32 %s2516_s7, 4  ;;  %p1023_p11 = scmp.ne.s32.totalorder %s1858_s25, 0 }
  0x51   : > { %s2055_s9 = scalar_select %p194_p9, %s1858_s25, 1 }
  0x52   : > { %s2061_s5 = scalar_lea.vmem [#allocation12], %s1022_s8  ;;  %200 = sbr.rel (%p1023_p11) target bundleno = 509 (0x1fd), region = 36 }
  0x53   : > { %s2066_s22 = sshll.u32 (!%p1023_p11), %s1862_s26, 10  ;;  %s1884_s17 = smov (!%p1023_p11), [#allocation5]  }
  0x54   : > { %s203_s10 = sld [smem:[#allocation8 + %s2066_s22]] (!%p1023_p11)  ;;  %s213_s28 = sshll.u32 (!%p1023_p11), %s1884_s17, 4  ;;  %s2070_s28 = int_to_ptr.vmem [resolvable:$true] %s213_s28 }
  0x55   : > { %s217_s19 = sadd.s32 (!%p1023_p11), 1, %s2066_s22  ;;  %s234_s8 = sadd.s32 (!%p1023_p11), 2, %s2066_s22 }
  0x56   : > { %s2072_s27 = sld [smem:[#allocation8 + %s217_s19]] (!%p1023_p11)  ;;  %s1885_s30 = smov (!%p1023_p11), [#allocation5 + $0x1]  }
  0x57   : > { %s230_s13 = sshll.u32 %s1885_s30, 4  ;;  %s2075_s7 = sld [smem:[#allocation8 + %s234_s8]]  ;;  %s2077_s13 = int_to_ptr.vmem [resolvable:$true] %s230_s13 }
  0x58   : > { %s1886_s12 = smov [#allocation5 + $0x2]   ;;  %s2087_s21 = scalar_lea.hbm %s2508_s1, 4096 }
  0x59   : > { %s247_s2 = sshll.u32 %s1886_s12, 4  ;;  %s2082_s2 = int_to_ptr.vmem [resolvable:$true] %s247_s2 }
  0x5a   : > { %s1026_s14 = sshll.u32 %s203_s10, 4 }
  0x5b   : > { %s205_s23 = scalar_lea.hbm %s2508_s1, %s1026_s14 }
  0x5c   : > { %s1348_s17 = scalar_lea.hbm %s205_s23, 16  ;;  %p1351_p12 = scmp.lt.s32.totalorder %s205_s23, %s2508_s1 }
  0x5d   : > { %p1349_p13 = scmp.ne.s32.totalorder %s205_s23, %s1348_s17  ;;  %p1352_p0 = scmp.lt.s32.totalorder %s2087_s21, %s1348_s17 }
  0x5f   : > { %p1353_p1 = por %p1352_p0, %p1351_p12 }
  0x61   : > { %p1354_p2 = pnand %p1353_p1, %p1349_p13 }
  0x63   : > { %1357 = shalt.err (!%p1354_p2)  }
  0x64   : > { %s1358_s24 = scalar_lea.vmem %s2070_s28, 16  ;;  %s2096_s11 = scalar_lea.vmem %s2070_s28, 256 }
  0x65   : > { %p1359_p4 = scmp.ne.s32.totalorder %s2070_s28, %s1358_s24  ;;  %p1363_p8 = scmp.lt.s32.totalorder %s2070_s28, %s2070_s28 }
  0x66   : > { %p1364_p5 = scmp.lt.s32.totalorder %s2096_s11, %s1358_s24 }
  0x68   : > { %p1365_p6 = por %p1364_p5, %p1363_p8 }
  0x6a   : > { %p1366_p10 = pnand %p1365_p6, %p1359_p4 }
  0x6c   : > { %1369 = shalt.err (!%p1366_p10)  }
  0x6d   : > { %216 = dma.hbm_to_vmem [thread:$0]  %s205_s23, 16, %s2070_s28, [#allocation6] }
  0x6e   : > { %s1027_s15 = sshll.u32 %s2072_s27, 4  ;;  %s251_s14 = sadd.s32 3, %s2066_s22 }
  0x6f   : > { %s220_s17 = scalar_lea.hbm %s2508_s1, %s1027_s15  ;;  %s1028_s19 = sshll.u32 %s2075_s7, 4 }
  0x70   : > { %s1370_s8 = scalar_lea.hbm %s220_s17, 16  ;;  %p1373_p11 = scmp.lt.s32.totalorder %s220_s17, %s2508_s1 }
  0x71   : > { %p1371_p9 = scmp.ne.s32.totalorder %s220_s17, %s1370_s8  ;;  %p1374_p13 = scmp.lt.s32.totalorder %s2087_s21, %s1370_s8 }
  0x73   : > { %p1375_p12 = por %p1374_p13, %p1373_p11 }
  0x75   : > { %p1376_p0 = pnand %p1375_p12, %p1371_p9 }
  0x77   : > { %1379 = shalt.err (!%p1376_p0)  }
  0x78   : > { %s1380_s23 = scalar_lea.vmem %s2077_s13, 16  ;;  %p1385_p2 = scmp.lt.s32.totalorder %s2077_s13, %s2070_s28 }
  0x79   : > { %p1381_p1 = scmp.ne.s32.totalorder %s2077_s13, %s1380_s23  ;;  %p1386_p4 = scmp.lt.s32.totalorder %s2096_s11, %s1380_s23 }
  0x7b   : > { %p1387_p8 = por %p1386_p4, %p1385_p2 }
  0x7d   : > { %p1388_p5 = pnand %p1387_p8, %p1381_p1 }
  0x7f   : > { %1391 = shalt.err (!%p1388_p5)  }
  0x80   : > { %233 = dma.hbm_to_vmem [thread:$0]  %s220_s17, 16, %s2077_s13, [#allocation6 + $0x1] }
  0x81   : > { %s237_s15 = scalar_lea.hbm %s2508_s1, %s1028_s19  ;;  %s252_s12 = sld [smem:[#allocation8 + %s251_s14]] }
  0x82   : > { %s1392_s10 = scalar_lea.hbm %s237_s15, 16  ;;  %p1395_p10 = scmp.lt.s32.totalorder %s237_s15, %s2508_s1 }
  0x83   : > { %p1393_p6 = scmp.ne.s32.totalorder %s237_s15, %s1392_s10  ;;  %p1396_p9 = scmp.lt.s32.totalorder %s2087_s21, %s1392_s10 }
  0x85   : > { %p1397_p11 = por %p1396_p9, %p1395_p10 }
  0x87   : > { %p1398_p13 = pnand %p1397_p11, %p1393_p6 }
  0x89   : > { %1401 = shalt.err (!%p1398_p13)  }
  0x8a   : > { %s1402_s13 = scalar_lea.vmem %s2082_s2, 16  ;;  %p1407_p0 = scmp.lt.s32.totalorder %s2082_s2, %s2070_s28 }
  0x8b   : > { %p1403_p12 = scmp.ne.s32.totalorder %s2082_s2, %s1402_s13  ;;  %p1408_p1 = scmp.lt.s32.totalorder %s2096_s11, %s1402_s13 }
  0x8d   : > { %p1409_p2 = por %p1408_p1, %p1407_p0 }
  0x8f   : > { %p1410_p4 = pnand %p1409_p2, %p1403_p12 }
  0x91   : > { %1413 = shalt.err (!%p1410_p4)  }
  0x92   : > { %250 = dma.hbm_to_vmem [thread:$0]  %s237_s15, 16, %s2082_s2, [#allocation6 + $0x2] }
  0x93   : > { %s268_s14 = sadd.s32 4, %s2066_s22  ;;  %s1887_s17 = smov [#allocation5 + $0x3]  }
  0x94   : > { %s264_s19 = sshll.u32 %s1887_s17, 4  ;;  %s269_s24 = sld [smem:[#allocation8 + %s268_s14]]  ;;  %s265_s19 = int_to_ptr.vmem [resolvable:$true] %s264_s19 }
  0x95   : > { %s1888_s23 = smov [#allocation5 + $0x4]   ;;  %s285_s27 = sadd.s32 5, %s2066_s22 }
  0x96   : > { %s281_s7 = sshll.u32 %s1888_s23, 4  ;;  %s1029_s10 = sshll.u32 %s252_s12, 4  ;;  %s2133_s7 = int_to_ptr.vmem [resolvable:$true] %s281_s7 }
  0x97   : > { %s254_s13 = scalar_lea.hbm %s2508_s1, %s1029_s10  ;;  %s2138_s18 = sld [smem:[#allocation8 + %s285_s27]] }
  0x98   : > { %s1414_s20 = scalar_lea.hbm %s254_s13, 16  ;;  %p1417_p5 = scmp.lt.s32.totalorder %s254_s13, %s2508_s1 }
  0x99   : > { %p1415_p8 = scmp.ne.s32.totalorder %s254_s13, %s1414_s20  ;;  %p1418_p6 = scmp.lt.s32.totalorder %s2087_s21, %s1414_s20 }
  0x9b   : > { %p1419_p10 = por %p1418_p6, %p1417_p5 }
  0x9d   : > { %p1420_p9 = pnand %p1419_p10, %p1415_p8 }
  0x9f   : > { %1423 = shalt.err (!%p1420_p9)  }
  0xa0   : > { %s1424_s14 = scalar_lea.vmem %s265_s19, 16  ;;  %p1429_p13 = scmp.lt.s32.totalorder %s265_s19, %s2070_s28 }
  0xa1   : > { %p1425_p11 = scmp.ne.s32.totalorder %s265_s19, %s1424_s14  ;;  %p1430_p12 = scmp.lt.s32.totalorder %s2096_s11, %s1424_s14 }
  0xa3   : > { %p1431_p0 = por %p1430_p12, %p1429_p13 }
  0xa5   : > { %p1432_p1 = pnand %p1431_p0, %p1425_p11 }
  0xa7   : > { %1435 = shalt.err (!%p1432_p1)  }
  0xa8   : > { %267 = dma.hbm_to_vmem [thread:$0]  %s254_s13, 16, %s265_s19, [#allocation6 + $0x3] }
  0xa9   : > { %s1030_s12 = sshll.u32 %s269_s24, 4  ;;  %s1889_s20 = smov [#allocation5 + $0x5]  }
  0xaa   : > { %s271_s27 = scalar_lea.hbm %s2508_s1, %s1030_s12  ;;  %s298_s10 = sshll.u32 %s1889_s20, 4  ;;  %s299_s10 = int_to_ptr.vmem [resolvable:$true] %s298_s10 }
  0xab   : > { %s1436_s8 = scalar_lea.hbm %s271_s27, 16  ;;  %p1439_p4 = scmp.lt.s32.totalorder %s271_s27, %s2508_s1 }
  0xac   : > { %p1437_p2 = scmp.ne.s32.totalorder %s271_s27, %s1436_s8  ;;  %p1440_p8 = scmp.lt.s32.totalorder %s2087_s21, %s1436_s8 }
  0xae   : > { %p1441_p5 = por %p1440_p8, %p1439_p4 }
  0xb0   : > { %p1442_p6 = pnand %p1441_p5, %p1437_p2 }
  0xb2   : > { %1445 = shalt.err (!%p1442_p6)  }
  0xb3   : > { %s1446_s19 = scalar_lea.vmem %s2133_s7, 16  ;;  %p1451_p9 = scmp.lt.s32.totalorder %s2133_s7, %s2070_s28 }
  0xb4   : > { %p1447_p10 = scmp.ne.s32.totalorder %s2133_s7, %s1446_s19  ;;  %p1452_p11 = scmp.lt.s32.totalorder %s2096_s11, %s1446_s19 }
  0xb6   : > { %p1453_p13 = por %p1452_p11, %p1451_p9 }
  0xb8   : > { %p1454_p12 = pnand %p1453_p13, %p1447_p10 }
  0xba   : > { %1457 = shalt.err (!%p1454_p12)  }
  0xbb   : > { %284 = dma.hbm_to_vmem [thread:$0]  %s271_s27, 16, %s2133_s7, [#allocation6 + $0x4] }
  0xbc   : > { %s302_s24 = sadd.s32 6, %s2066_s22  ;;  %s1031_s13 = sshll.u32 %s2138_s18, 4 }
  0xbd   : > { %s303_s15 = sld [smem:[#allocation8 + %s302_s24]]  ;;  %s288_s17 = scalar_lea.hbm %s2508_s1, %s1031_s13 }
  0xbe   : > { %s1458_s23 = scalar_lea.hbm %s288_s17, 16  ;;  %p1461_p1 = scmp.lt.s32.totalorder %s288_s17, %s2508_s1 }
  0xbf   : > { %p1459_p0 = scmp.ne.s32.totalorder %s288_s17, %s1458_s23  ;;  %p1462_p2 = scmp.lt.s32.totalorder %s2087_s21, %s1458_s23 }
  0xc1   : > { %p1463_p4 = por %p1462_p2, %p1461_p1 }
  0xc3   : > { %p1464_p8 = pnand %p1463_p4, %p1459_p0 }
  0xc5   : > { %1467 = shalt.err (!%p1464_p8)  }
  0xc6   : > { %s1468_s30 = scalar_lea.vmem %s299_s10, 16  ;;  %p1473_p6 = scmp.lt.s32.totalorder %s299_s10, %s2070_s28 }
  0xc7   : > { %p1469_p5 = scmp.ne.s32.totalorder %s299_s10, %s1468_s30  ;;  %p1474_p10 = scmp.lt.s32.totalorder %s2096_s11, %s1468_s30 }
  0xc9   : > { %p1475_p9 = por %p1474_p10, %p1473_p6 }
  0xcb   : > { %p1476_p11 = pnand %p1475_p9, %p1469_p5 }
  0xcd   : > { %1479 = shalt.err (!%p1476_p11)  }
  0xce   : > { %301 = dma.hbm_to_vmem [thread:$0]  %s288_s17, 16, %s299_s10, [#allocation6 + $0x5] }
  0xcf   : > { %s1890_s18 = smov [#allocation5 + $0x6]   ;;  %s319_s27 = sadd.s32 7, %s2066_s22 }
  0xd0   : > { %s315_s7 = sshll.u32 %s1890_s18, 4  ;;  %s320_s2 = sld [smem:[#allocation8 + %s319_s27]]  ;;  %s316_s7 = int_to_ptr.vmem [resolvable:$true] %s315_s7 }
  0xd1   : > { %s1032_s19 = sshll.u32 %s303_s15, 4  ;;  %s1891_s24 = smov [#allocation5 + $0x7]  }
  0xd2   : > { %s332_s13 = sshll.u32 %s1891_s24, 4  ;;  %s305_s23 = scalar_lea.hbm %s2508_s1, %s1032_s19  ;;  %s333_s13 = int_to_ptr.vmem [resolvable:$true] %s332_s13 }
  0xd3   : > { %s1480_s20 = scalar_lea.hbm %s305_s23, 16  ;;  %p1483_p12 = scmp.lt.s32.totalorder %s305_s23, %s2508_s1 }
  0xd4   : > { %p1481_p13 = scmp.ne.s32.totalorder %s305_s23, %s1480_s20  ;;  %p1484_p0 = scmp.lt.s32.totalorder %s2087_s21, %s1480_s20 }
  0xd6   : > { %p1485_p1 = por %p1484_p0, %p1483_p12 }
  0xd8   : > { %p1486_p2 = pnand %p1485_p1, %p1481_p13 }
  0xda   : > { %1489 = shalt.err (!%p1486_p2)  }
  0xdb   : > { %s1490_s22 = scalar_lea.vmem %s316_s7, 16  ;;  %p1495_p8 = scmp.lt.s32.totalorder %s316_s7, %s2070_s28 }
  0xdc   : > { %p1491_p4 = scmp.ne.s32.totalorder %s316_s7, %s1490_s22  ;;  %p1496_p5 = scmp.lt.s32.totalorder %s2096_s11, %s1490_s22 }
  0xde   : > { %p1497_p6 = por %p1496_p5, %p1495_p8 }
  0xe0   : > { %p1498_p10 = pnand %p1497_p6, %p1491_p4 }
  0xe2   : > { %1501 = shalt.err (!%p1498_p10)  }
  0xe3   : > { %318 = dma.hbm_to_vmem [thread:$0]  %s305_s23, 16, %s316_s7, [#allocation6 + $0x6] }
  0xe4   : > { %s1033_s10 = sshll.u32 %s320_s2, 4 }
  0xe5   : > { %s322_s18 = scalar_lea.hbm %s2508_s1, %s1033_s10 }
  0xe6   : > { %s1502_s27 = scalar_lea.hbm %s322_s18, 16  ;;  %p1505_p11 = scmp.lt.s32.totalorder %s322_s18, %s2508_s1 }
  0xe7   : > { %p1503_p9 = scmp.ne.s32.totalorder %s322_s18, %s1502_s27  ;;  %p1506_p13 = scmp.lt.s32.totalorder %s2087_s21, %s1502_s27 }
  0xe9   : > { %p1507_p12 = por %p1506_p13, %p1505_p11 }
  0xeb   : > { %p1508_p0 = pnand %p1507_p12, %p1503_p9 }
  0xed   : > { %1511 = shalt.err (!%p1508_p0)  }
  0xee   : > { %s1512_s14 = scalar_lea.vmem %s333_s13, 16  ;;  %p1517_p2 = scmp.lt.s32.totalorder %s333_s13, %s2070_s28 }
  0xef   : > { %p1513_p1 = scmp.ne.s32.totalorder %s333_s13, %s1512_s14  ;;  %p1518_p4 = scmp.lt.s32.totalorder %s2096_s11, %s1512_s14 }
  0xf1   : > { %p1519_p8 = por %p1518_p4, %p1517_p2 }
  0xf3   : > { %p1520_p5 = pnand %p1519_p8, %p1513_p1 }
  0xf5   : > { %1523 = shalt.err (!%p1520_p5)  }
  0xf6   : > { %335 = dma.hbm_to_vmem [thread:$0]  %s322_s18, 16, %s333_s13, [#allocation6 + $0x7] }
  0xf7   : > { %s2189_s7 = smov 0  }
  0xf8 LB: >> { %s342_s2 = sand.u32 1, %s1878_s7  ;;  %s1878_s7 = sphi %s2189_s7, %s2555_s7  }
  0xf9   : >> { %s2195_s12 = sshll.u32 %s342_s2, 3 }
  0xfa   : >> { %s344_s23 = scalar_lea.sflag [#allocation6], %s2195_s12 }
  0xfb   : >> { %1812 = dma.done.wait %s344_s23, 16 }
  0xfc   : >> { %1813 = vsyncadd %s344_s23, 4294967280  ;;  %s873_s20 = scalar_lea.sflag %s344_s23, 1 [#allocation6] }
  0xfd   : >> { %1814 = dma.done.wait %s873_s20, 16 }
  0xfe   : >> { %1815 = vsyncadd %s873_s20, 4294967280  ;;  %s876_s8 = scalar_lea.sflag %s344_s23, 2 [#allocation6] }
  0xff   : >> { %1816 = dma.done.wait %s876_s8, 16 }
 0x100   : >> { %1817 = vsyncadd %s876_s8, 4294967280  ;;  %s879_s13 = scalar_lea.sflag %s344_s23, 3 [#allocation6] }
 0x101   : >> { %1818 = dma.done.wait %s879_s13, 16 }
 0x102   : >> { %1819 = vsyncadd %s879_s13, 4294967280  ;;  %s882_s30 = scalar_lea.sflag %s344_s23, 4 [#allocation6] }
 0x103   : >> { %1820 = dma.done.wait %s882_s30, 16 }
 0x104   : >> { %1821 = vsyncadd %s882_s30, 4294967280  ;;  %s885_s22 = scalar_lea.sflag %s344_s23, 5 [#allocation6] }
 0x105   : >> { %1822 = dma.done.wait %s885_s22, 16 }
 0x106   : >> { %1823 = vsyncadd %s885_s22, 4294967280  ;;  %s888_s10 = scalar_lea.sflag %s344_s23, 6 [#allocation6] }
 0x107   : >> { %1824 = dma.done.wait %s888_s10, 16 }
 0x108   : >> { %1825 = vsyncadd %s888_s10, 4294967280  ;;  %s891_s15 = scalar_lea.sflag %s344_s23, 7 [#allocation6] }
 0x109   : >> { %1826 = dma.done.wait %s891_s15, 16 }
 0x10a   : >> { %1827 = vsyncadd %s891_s15, 4294967280  ;;  %s2552_s26 = sld [smem:[#allocation71_spill]]  ;;  %s2199_s17 = sadd.s32 1, %s1878_s7  }
 0x10b   : >> { %s381_s18 = ssub.s32 1, %s342_s2  ;;  %p1185_p10 = scmp.lt.s32.totalorder %s2199_s17, 8 }
 0x10c   : >> { %s1045_s24 = sshll.u32 %s381_s18, 3 }
 0x10d   : >> { %s1150_s23 = scalar_select %p1185_p10, [#allocation8], [#allocation47] }
 0x10e   : >> { %s2213_s13 = scalar_lea.vmem [#allocation5], %s1045_s24 }
 0x10f   : >> { %s397_s2 = sshll.u32 %s2213_s13, 4  ;;  %s902_s22 = scalar_lea.vmem %s2213_s13, 1 [#allocation5]  ;;  %s398_s2 = int_to_ptr.vmem [resolvable:$true] %s397_s2 }
 0x110   : >> { %s2553_s27 = sshll.u32 %s2552_s26, 3  ;;  %s415_s15 = sshll.u32 %s902_s22, 4  ;;  %s2227_s15 = int_to_ptr.vmem [resolvable:$true] %s415_s15 }
 0x111   : >> { %s382_s19 = sadd.s32 %s2553_s27, %s2199_s17  ;;  %s2224_s27 = scalar_lea.sflag [#allocation6], %s1045_s24 }
 0x112   : >> { %s2206_s14 = sshll.u32 %s382_s19, 7 }
 0x113   : >> { %s1151_s20 = scalar_select %p1185_p10, %s2206_s14, 0 }
 0x114   : >> { %s401_s30 = sadd.s32 1, %s2206_s14  ;;  %s419_s16 = sadd.s32 2, %s2206_s14 }
 0x115   : >> { %s384_s8 = sld [smem:[%s1150_s23 + %s1151_s20]]  ;;  %s2584_s30 = smov (!%p1185_p10, %s401_s30), 0 }
 0x116   : >> { %s1153_s10 = scalar_select %p1185_p10, [#allocation8], [#allocation48] }
 0x118   : >> { %s2222_s18 = sld [smem:[%s1153_s10 + %s2584_s30]] }
 0x11b   : >> { %s1044_s23 = sshll.u32 %s384_s8, 4 }
 0x11c   : >> { %s386_s4 = scalar_lea.hbm %s2508_s1, %s1044_s23 }
 0x11d   : >> { %s1524_s0 = scalar_lea.hbm %s386_s4, 16  ;;  %p1529_p12 = scmp.lt.s32.totalorder %s386_s4, %s2508_s1 }
 0x11e   : >> { %p1525_p9 = scmp.ne.s32.totalorder %s386_s4, %s1524_s0  ;;  %p1530_p0 = scmp.lt.s32.totalorder %s2087_s21, %s1524_s0 }
 0x120   : >> { %p1526_p11 = pnand %p1525_p9, %p1185_p10  ;;  %p1531_p1 = por %p1530_p0, %p1529_p12 }
 0x122   : >> { %p1527_p13 = pneg %p1526_p11 }
 0x124   : >> { %p1532_p2 = pnand %p1531_p1, %p1527_p13 }
 0x126   : >> { %1535 = shalt.err (!%p1532_p2)  }
 0x127   : >> { %s1536_s24 = scalar_lea.vmem %s398_s2, 16  ;;  %p1543_p6 = scmp.lt.s32.totalorder %s398_s2, %s2070_s28 }
 0x128   : >> { %p1537_p4 = scmp.ne.s32.totalorder %s398_s2, %s1536_s24  ;;  %p1544_p7 = scmp.lt.s32.totalorder %s2096_s11, %s1536_s24 }
 0x12a   : >> { %p1538_p8 = pnand %p1537_p4, %p1185_p10  ;;  %p1545_p9 = por %p1544_p7, %p1543_p6 }
 0x12c   : >> { %p1539_p5 = pneg %p1538_p8 }
 0x12e   : >> { %p1546_p11 = pnand %p1545_p9, %p1539_p5 }
 0x130   : >> { %1549 = shalt.err (!%p1546_p11)  }
 0x131   : >> { %1152 = dma.hbm_to_vmem [thread:$0]  (%p1185_p10), %s386_s4, 16, %s398_s2, %s2224_s27 }
 0x132   : >> { %s1156_s0 = scalar_select %p1185_p10, [#allocation8], [#allocation49] }
 0x133   : >> { %s2586_s16 = smov (!%p1185_p10, %s419_s16), 0  ;;  %s1046_s29 = sshll.u32 %s2222_s18, 4 }
 0x134   : >> { %s910_s8 = scalar_lea.vmem %s2213_s13, 2 [#allocation5]  ;;  %s404_s20 = scalar_lea.hbm %s2508_s1, %s1046_s29 }
 0x135   : >> { %s2255_s22 = sld [smem:[%s1156_s0 + %s2586_s16]]  ;;  %s1550_s30 = scalar_lea.hbm %s404_s20, 16 }
 0x136   : >> { %p1551_p7 = scmp.ne.s32.totalorder %s404_s20, %s1550_s30  ;;  %p1555_p12 = scmp.lt.s32.totalorder %s404_s20, %s2508_s1 }
 0x137   : >> { %p1556_p0 = scmp.lt.s32.totalorder %s2087_s21, %s1550_s30 }
 0x138   : >> { %p1552_p6 = pnand %p1551_p7, %p1185_p10 }
 0x139   : >> { %p1557_p1 = por %p1556_p0, %p1555_p12 }
 0x13a   : >> { %p1553_p13 = pneg %p1552_p6 }
 0x13c   : >> { %p1558_p2 = pnand %p1557_p1, %p1553_p13 }
 0x13e   : >> { %1561 = shalt.err (!%p1558_p2)  }
 0x13f   : >> { %s1562_s4 = scalar_lea.vmem %s2227_s15, 16  ;;  %p1569_p9 = scmp.lt.s32.totalorder %s2227_s15, %s2070_s28 }
 0x140   : >> { %p1563_p4 = scmp.ne.s32.totalorder %s2227_s15, %s1562_s4  ;;  %p1570_p11 = scmp.lt.s32.totalorder %s2096_s11, %s1562_s4 }
 0x142   : >> { %p1564_p8 = pnand %p1563_p4, %p1185_p10  ;;  %p1571_p7 = por %p1570_p11, %p1569_p9 }
 0x144   : >> { %p1565_p5 = pneg %p1564_p8 }
 0x146   : >> { %p1572_p6 = pnand %p1571_p7, %p1565_p5 }
 0x148   : >> { %1575 = shalt.err (!%p1572_p6)  }
 0x149   : >> { %s2554_s16 = scalar_lea.sflag %s2224_s27, 1 [#allocation6]  ;;  %s433_s2 = sshll.u32 %s910_s8, 4  ;;  %s434_s2 = int_to_ptr.vmem [resolvable:$true] %s433_s2 }
 0x14a   : >> { %1155 = dma.hbm_to_vmem [thread:$0]  (%p1185_p10), %s404_s20, 16, %s2227_s15, %s2554_s16 }
 0x14b   : >> { %s437_s18 = sadd.s32 3, %s2206_s14  ;;  %s913_s19 = scalar_lea.sflag %s2224_s27, 2 [#allocation6] }
 0x14c   : >> { %s1159_s0 = scalar_select %p1185_p10, [#allocation8], [#allocation50] }
 0x14d   : >> { %s2588_s18 = smov (!%p1185_p10, %s437_s18), 0  ;;  %s1049_s29 = sshll.u32 %s2255_s22, 4 }
 0x14e   : >> { %s918_s10 = scalar_lea.vmem %s2213_s13, 3 [#allocation5]  ;;  %s422_s24 = scalar_lea.hbm %s2508_s1, %s1049_s29 }
 0x14f   : >> { %s2286_s4 = sld [smem:[%s1159_s0 + %s2588_s18]]  ;;  %s1576_s26 = scalar_lea.hbm %s422_s24, 16 }
 0x150   : >> { %p1577_p13 = scmp.ne.s32.totalorder %s422_s24, %s1576_s26  ;;  %p1581_p1 = scmp.lt.s32.totalorder %s422_s24, %s2508_s1 }
 0x151   : >> { %p1582_p2 = scmp.lt.s32.totalorder %s2087_s21, %s1576_s26 }
 0x152   : >> { %p1578_p12 = pnand %p1577_p13, %p1185_p10 }
 0x153   : >> { %p1583_p4 = por %p1582_p2, %p1581_p1 }
 0x154   : >> { %p1579_p0 = pneg %p1578_p12 }
 0x156   : >> { %p1584_p8 = pnand %p1583_p4, %p1579_p0 }
 0x158   : >> { %1587 = shalt.err (!%p1584_p8)  }
 0x159   : >> { %s1588_s20 = scalar_lea.vmem %s434_s2, 16  ;;  %p1595_p7 = scmp.lt.s32.totalorder %s434_s2, %s2070_s28 }
 0x15a   : >> { %p1589_p5 = scmp.ne.s32.totalorder %s434_s2, %s1588_s20  ;;  %p1596_p6 = scmp.lt.s32.totalorder %s2096_s11, %s1588_s20 }
 0x15c   : >> { %p1590_p9 = pnand %p1589_p5, %p1185_p10  ;;  %p1597_p13 = por %p1596_p6, %p1595_p7 }
 0x15e   : >> { %p1591_p11 = pneg %p1590_p9 }
 0x160   : >> { %p1598_p12 = pnand %p1597_p13, %p1591_p11 }
 0x162   : >> { %1601 = shalt.err (!%p1598_p12)  }
 0x163   : >> { %1158 = dma.hbm_to_vmem [thread:$0]  (%p1185_p10), %s422_s24, 16, %s434_s2, %s913_s19 }
 0x164   : >> { %s451_s26 = sshll.u32 %s918_s10, 4  ;;  %s455_s22 = sadd.s32 4, %s2206_s14  ;;  %s452_s26 = int_to_ptr.vmem [resolvable:$true] %s451_s26 }
 0x165   : >> { %s921_s16 = scalar_lea.sflag %s2224_s27, 3 [#allocation6]  ;;  %s2590_s22 = smov (!%p1185_p10, %s455_s22), 0 }
 0x166   : >> { %s1162_s18 = scalar_select %p1185_p10, [#allocation8], [#allocation51] }
 0x167   : >> { %s1052_s0 = sshll.u32 %s2286_s4, 4  ;;  %s926_s29 = scalar_lea.vmem %s2213_s13, 4 [#allocation5] }
 0x168   : >> { %s440_s15 = scalar_lea.hbm %s2508_s1, %s1052_s0  ;;  %s2311_s8 = sld [smem:[%s1162_s18 + %s2590_s22]] }
 0x169   : >> { %s1602_s20 = scalar_lea.hbm %s440_s15, 16  ;;  %p1607_p4 = scmp.lt.s32.totalorder %s440_s15, %s2508_s1 }
 0x16a   : >> { %p1603_p0 = scmp.ne.s32.totalorder %s440_s15, %s1602_s20  ;;  %p1608_p8 = scmp.lt.s32.totalorder %s2087_s21, %s1602_s20 }
 0x16c   : >> { %p1604_p1 = pnand %p1603_p0, %p1185_p10  ;;  %p1609_p5 = por %p1608_p8, %p1607_p4 }
 0x16e   : >> { %p1605_p2 = pneg %p1604_p1 }
 0x170   : >> { %p1610_p9 = pnand %p1609_p5, %p1605_p2 }
 0x172   : >> { %1613 = shalt.err (!%p1610_p9)  }
 0x173   : >> { %s1614_s10 = scalar_lea.vmem %s452_s26, 16  ;;  %p1621_p13 = scmp.lt.s32.totalorder %s452_s26, %s2070_s28 }
 0x174   : >> { %p1615_p11 = scmp.ne.s32.totalorder %s452_s26, %s1614_s10  ;;  %p1622_p12 = scmp.lt.s32.totalorder %s2096_s11, %s1614_s10 }
 0x176   : >> { %p1616_p7 = pnand %p1615_p11, %p1185_p10  ;;  %p1623_p0 = por %p1622_p12, %p1621_p13 }
 0x178   : >> { %p1617_p6 = pneg %p1616_p7 }
 0x17a   : >> { %p1624_p1 = pnand %p1623_p0, %p1617_p6 }
 0x17c   : >> { %1627 = shalt.err (!%p1624_p1)  }
 0x17d   : >> { %1161 = dma.hbm_to_vmem [thread:$0]  (%p1185_p10), %s440_s15, 16, %s452_s26, %s921_s16 }
 0x17e   : >> { %s469_s24 = sshll.u32 %s926_s29, 4  ;;  %s473_s4 = sadd.s32 5, %s2206_s14  ;;  %s470_s24 = int_to_ptr.vmem [resolvable:$true] %s469_s24 }
 0x17f   : >> { %s929_s22 = scalar_lea.sflag %s2224_s27, 4 [#allocation6]  ;;  %s2592_s4 = smov (!%p1185_p10, %s473_s4), 0 }
 0x180   : >> { %s1165_s18 = scalar_select %p1185_p10, [#allocation8], [#allocation52] }
 0x181   : >> { %s1055_s0 = sshll.u32 %s2311_s8, 4  ;;  %s934_s23 = scalar_lea.vmem %s2213_s13, 5 [#allocation5] }
 0x182   : >> { %s458_s2 = scalar_lea.hbm %s2508_s1, %s1055_s0  ;;  %s2336_s19 = sld [smem:[%s1165_s18 + %s2592_s4]] }
 0x183   : >> { %s1628_s10 = scalar_lea.hbm %s458_s2, 16  ;;  %p1633_p5 = scmp.lt.s32.totalorder %s458_s2, %s2508_s1 }
 0x184   : >> { %p1629_p2 = scmp.ne.s32.totalorder %s458_s2, %s1628_s10  ;;  %p1634_p9 = scmp.lt.s32.totalorder %s2087_s21, %s1628_s10 }
 0x186   : >> { %p1630_p4 = pnand %p1629_p2, %p1185_p10  ;;  %p1635_p11 = por %p1634_p9, %p1633_p5 }
 0x188   : >> { %p1631_p8 = pneg %p1630_p4 }
 0x18a   : >> { %p1636_p7 = pnand %p1635_p11, %p1631_p8 }
 0x18c   : >> { %1639 = shalt.err (!%p1636_p7)  }
 0x18d   : >> { %s1640_s29 = scalar_lea.vmem %s470_s24, 16  ;;  %p1647_p0 = scmp.lt.s32.totalorder %s470_s24, %s2070_s28 }
 0x18e   : >> { %p1641_p6 = scmp.ne.s32.totalorder %s470_s24, %s1640_s29  ;;  %p1648_p1 = scmp.lt.s32.totalorder %s2096_s11, %s1640_s29 }
 0x190   : >> { %p1642_p13 = pnand %p1641_p6, %p1185_p10  ;;  %p1649_p2 = por %p1648_p1, %p1647_p0 }
 0x192   : >> { %p1643_p12 = pneg %p1642_p13 }
 0x194   : >> { %p1650_p4 = pnand %p1649_p2, %p1643_p12 }
 0x196   : >> { %1653 = shalt.err (!%p1650_p4)  }
 0x197   : >> { %1164 = dma.hbm_to_vmem [thread:$0]  (%p1185_p10), %s458_s2, 16, %s470_s24, %s929_s22 }
 0x198   : >> { %s487_s15 = sshll.u32 %s934_s23, 4  ;;  %s491_s8 = sadd.s32 6, %s2206_s14  ;;  %s488_s15 = int_to_ptr.vmem [resolvable:$true] %s487_s15 }
 0x199   : >> { %s937_s4 = scalar_lea.sflag %s2224_s27, 5 [#allocation6]  ;;  %s2594_s8 = smov (!%p1185_p10, %s491_s8), 0 }
 0x19a   : >> { %s1168_s18 = scalar_select %p1185_p10, [#allocation8], [#allocation53] }
 0x19b   : >> { %s1058_s0 = sshll.u32 %s2336_s19, 4  ;;  %s942_s30 = scalar_lea.vmem %s2213_s13, 6 [#allocation5] }
 0x19c   : >> { %s476_s26 = scalar_lea.hbm %s2508_s1, %s1058_s0  ;;  %s2361_s16 = sld [smem:[%s1168_s18 + %s2594_s8]] }
 0x19d   : >> { %s1654_s29 = scalar_lea.hbm %s476_s26, 16  ;;  %p1659_p11 = scmp.lt.s32.totalorder %s476_s26, %s2508_s1 }
 0x19e   : >> { %p1655_p8 = scmp.ne.s32.totalorder %s476_s26, %s1654_s29  ;;  %p1660_p7 = scmp.lt.s32.totalorder %s2087_s21, %s1654_s29 }
 0x1a0   : >> { %p1656_p5 = pnand %p1655_p8, %p1185_p10  ;;  %p1661_p6 = por %p1660_p7, %p1659_p11 }
 0x1a2   : >> { %p1657_p9 = pneg %p1656_p5 }
 0x1a4   : >> { %p1662_p13 = pnand %p1661_p6, %p1657_p9 }
 0x1a6   : >> { %1665 = shalt.err (!%p1662_p13)  }
 0x1a7   : >> { %s1666_s23 = scalar_lea.vmem %s488_s15, 16  ;;  %p1673_p2 = scmp.lt.s32.totalorder %s488_s15, %s2070_s28 }
 0x1a8   : >> { %p1667_p12 = scmp.ne.s32.totalorder %s488_s15, %s1666_s23  ;;  %p1674_p4 = scmp.lt.s32.totalorder %s2096_s11, %s1666_s23 }
 0x1aa   : >> { %p1668_p0 = pnand %p1667_p12, %p1185_p10  ;;  %p1675_p8 = por %p1674_p4, %p1673_p2 }
 0x1ac   : >> { %p1669_p1 = pneg %p1668_p0 }
 0x1ae   : >> { %p1676_p5 = pnand %p1675_p8, %p1669_p1 }
 0x1b0   : >> { %1679 = shalt.err (!%p1676_p5)  }
 0x1b1   : >> { %1167 = dma.hbm_to_vmem [thread:$0]  (%p1185_p10), %s476_s26, 16, %s488_s15, %s937_s4 }
 0x1b2   : >> { %s505_s2 = sshll.u32 %s942_s30, 4  ;;  %s509_s19 = sadd.s32 7, %s2206_s14  ;;  %s506_s2 = int_to_ptr.vmem [resolvable:$true] %s505_s2 }
 0x1b3   : >> { %s945_s8 = scalar_lea.sflag %s2224_s27, 6 [#allocation6]  ;;  %s2596_s19 = smov (!%p1185_p10, %s509_s19), 0 }
 0x1b4   : >> { %s1171_s18 = scalar_select %p1185_p10, [#allocation8], [#allocation54] }
 0x1b5   : >> { %s1061_s0 = sshll.u32 %s2361_s16, 4  ;;  %s950_s20 = scalar_lea.vmem %s2213_s13, 7 [#allocation5] }
 0x1b6   : >> { %s494_s24 = scalar_lea.hbm %s2508_s1, %s1061_s0  ;;  %s510_s22 = sld [smem:[%s1171_s18 + %s2596_s19]] }
 0x1b7   : >> { %s1680_s23 = scalar_lea.hbm %s494_s24, 16  ;;  %p1685_p6 = scmp.lt.s32.totalorder %s494_s24, %s2508_s1 }
 0x1b8   : >> { %p1681_p9 = scmp.ne.s32.totalorder %s494_s24, %s1680_s23  ;;  %p1686_p13 = scmp.lt.s32.totalorder %s2087_s21, %s1680_s23 }
 0x1ba   : >> { %p1682_p11 = pnand %p1681_p9, %p1185_p10  ;;  %p1687_p12 = por %p1686_p13, %p1685_p6 }
 0x1bc   : >> { %p1683_p7 = pneg %p1682_p11 }
 0x1be   : >> { %p1688_p0 = pnand %p1687_p12, %p1683_p7 }
 0x1c0   : >> { %1691 = shalt.err (!%p1688_p0)  }
 0x1c1   : >> { %s1692_s4 = scalar_lea.vmem %s506_s2, 16  ;;  %p1699_p8 = scmp.lt.s32.totalorder %s506_s2, %s2070_s28 }
 0x1c2   : >> { %p1693_p1 = scmp.ne.s32.totalorder %s506_s2, %s1692_s4  ;;  %p1700_p5 = scmp.lt.s32.totalorder %s2096_s11, %s1692_s4 }
 0x1c4   : >> { %p1694_p2 = pnand %p1693_p1, %p1185_p10  ;;  %p1701_p9 = por %p1700_p5, %p1699_p8 }
 0x1c6   : >> { %p1695_p4 = pneg %p1694_p2 }
 0x1c8   : >> { %p1702_p11 = pnand %p1701_p9, %p1695_p4 }
 0x1ca   : >> { %1705 = shalt.err (!%p1702_p11)  }
 0x1cb   : >> { %1170 = dma.hbm_to_vmem [thread:$0]  (%p1185_p10), %s494_s24, 16, %s506_s2, %s945_s8 }
 0x1cc   : >> { %s523_s13 = sshll.u32 %s950_s20, 4  ;;  %s953_s30 = scalar_lea.sflag %s2224_s27, 7 [#allocation6]  ;;  %s524_s13 = int_to_ptr.vmem [resolvable:$true] %s523_s13 }
 0x1cd   : >> { %s1064_s26 = sshll.u32 %s510_s22, 4 }
 0x1ce   : >> { %s512_s18 = scalar_lea.hbm %s2508_s1, %s1064_s26 }
 0x1cf   : >> { %s1706_s0 = scalar_lea.hbm %s512_s18, 16  ;;  %p1711_p12 = scmp.lt.s32.totalorder %s512_s18, %s2508_s1 }
 0x1d0   : >> { %p1707_p7 = scmp.ne.s32.totalorder %s512_s18, %s1706_s0  ;;  %p1712_p0 = scmp.lt.s32.totalorder %s2087_s21, %s1706_s0 }
 0x1d2   : >> { %p1708_p6 = pnand %p1707_p7, %p1185_p10  ;;  %p1713_p1 = por %p1712_p0, %p1711_p12 }
 0x1d4   : >> { %p1709_p13 = pneg %p1708_p6 }
 0x1d6   : >> { %p1714_p2 = pnand %p1713_p1, %p1709_p13 }
 0x1d8   : >> { %1717 = shalt.err (!%p1714_p2)  }
 0x1d9   : >> { %s1718_s27 = scalar_lea.vmem %s524_s13, 16  ;;  %p1725_p9 = scmp.lt.s32.totalorder %s524_s13, %s2070_s28 }
 0x1da   : >> { %p1719_p4 = scmp.ne.s32.totalorder %s524_s13, %s1718_s27  ;;  %p1726_p11 = scmp.lt.s32.totalorder %s2096_s11, %s1718_s27 }
 0x1dc   : >> { %p1720_p8 = pnand %p1719_p4, %p1185_p10  ;;  %p1727_p7 = por %p1726_p11, %p1725_p9 }
 0x1de   : >> { %p1721_p5 = pneg %p1720_p8 }
 0x1e0   : >> { %p1728_p6 = pnand %p1727_p7, %p1721_p5 }
 0x1e2   : >> { %1731 = shalt.err (!%p1728_p6)  }
 0x1e3   : >> { %1173 = dma.hbm_to_vmem [thread:$0]  (%p1185_p10), %s512_s18, 16, %s524_s13, %s953_s30 }
 0x1e4   : >> { %s527_s2 = scalar_lea.vmem [#allocation5], %s2195_s12  ;;  %s535_s8 = scalar_lea.vmem [#allocation2], %s1878_s7 }
 0x1e5   : >> { %v528_v0 = vld [vmem:[%s527_s2] sm:$0xff]  ;;  %s2555_s7 = smov %s2199_s17  ;;  %p2556_p13 = scmp.ge.s32.totalorder %s2199_s17, 8 }
 0x1e6   : >> { %v529_v1 = vrot.slane %v528_v0, 4  ;;  %vm540_vm0 = vcmask (%p2556_p13), 7168   ;;  %v1892_v9 = vmov (%p2556_p13), -inf   ;;  %v1893_v10 = vmov (%p2556_p13), 0.0  }
 0x1e7   : > { %541 = vst.msk [vmem:[#allocation3] sm:$0xff] (%p2556_p13), %vm540_vm0, %v1892_v9  ;;  %542 = vst.msk [vmem:[#allocation4] sm:$0xff] (%p2556_p13), %vm540_vm0, %v1893_v10 }
 0x1e8   : >> { %v530_v2 = vadd.f32 %v529_v1, %v528_v0 }
 0x1ea   : >> { %v531_v3 = vrot.slane %v530_v2, 2 }
 0x1ec   : >> { %v532_v4 = vadd.f32 %v531_v3, %v530_v2 }
 0x1ee   : >> { %v533_v5 = vrot.slane %v532_v4, 1  ;;  %340 = sbr.rel (!%p2556_p13) target bundleno = 248 (0xf8), region = 231 }
 0x1f0   : >> { %v534_v6 = vadd.f32 %v533_v5, %v532_v4 }
 0x1f2   : >> { %536 = vst [vmem:[%s535_s8] sm:$0x1] %v534_v6 }
 0x1f9   : > { %v537_v7 = vld [vmem:[#allocation2] sm:$0xff] }
 0x1fa   : > { %v538_v8 = vmul.f32 0.125, %v537_v7 }
 0x1fc   : > { %539 = vst [vmem:[#allocation2] sm:$0xff] %v538_v8 }
 0x1fd PF: > { %v559_v11 = vld [vmem:[%s2044_s6 + $0x78] sm:$0xff]  ;;  %v1894_v12 = vmov 0.0   ;;  %vm1895_vm1 = vmmov 0   ;;  %v558_v13 = vld [vmem:[%s2044_s6 + $0x70] sm:$0xff]  ;;  %v557_v14 = vld [vmem:[%s2044_s6 + $0x68] sm:$0xff]  ;;  %s1068_s21 = sshll.u32 %s1858_s25, 7  ;;  %s2557_s17 = scalar_lea.vmem %s2510_s3, %s2055_s9 }
 0x1fe   : > { %1112 = vmatprep.subr.mxu0 %v1894_v12  ;;  %1144 = vmatprep.mubr.msk.f32.mxu0 %vm1895_vm1, %v1894_v12  ;;  %v556_v15 = vld [vmem:[%s2044_s6 + $0x60] sm:$0xff]  ;;  %v555_v16 = vld [vmem:[%s2044_s6 + $0x58] sm:$0xff]  ;;  %v554_v17 = vld [vmem:[%s2044_s6 + $0x50] sm:$0xff]  ;;  %s661_s28 = sshra.s32 %s1068_s21, 7  ;;  %v1896_v33 = vmov 0   ;;  %vm657_vm2 = vcmask 7168  }
 0x1ff   : > { %1113 = vmatpush3.xpose.msra.mxu0 %v559_v11  ;;  %v553_v18 = vld [vmem:[%s2044_s6 + $0x48] sm:$0xff]  ;;  %v552_v19 = vld [vmem:[%s2044_s6 + $0x40] sm:$0xff]  ;;  %v551_v20 = vld [vmem:[%s2044_s6 + $0x38] sm:$0xff]  ;;  %s1069_s11 = sshll.u32 %s661_s28, 3  ;;  %1300 = vset.pattern.permute.xlu0 %v1896_v33  ;;  %p1070_p10 = scmp.ne.s32.totalorder %s1858_s25, 1 }
 0x200   : > { %1114 = vmatprep.subr.mxu0 %v1894_v12  ;;  %v550_v21 = vld [vmem:[%s2044_s6 + $0x30] sm:$0xff]  ;;  %v549_v22 = vld [vmem:[%s2044_s6 + $0x28] sm:$0xff]  ;;  %v548_v23 = vld [vmem:[%s2044_s6 + $0x20] sm:$0xff]  ;;  %s664_s20 = scalar_lea.vmem %s2061_s5, %s1069_s11 [#allocation12] }
 0x201   : > { %v547_v24 = vld [vmem:[%s2044_s6 + $0x18] sm:$0xff]  ;;  %v546_v25 = vld [vmem:[%s2044_s6 + $0x10] sm:$0xff]  ;;  %v545_v26 = vld [vmem:[%s2044_s6 + $0x8] sm:$0xff] }
 0x202   : > { %v544_v27 = vld [vmem:[%s2044_s6] sm:$0xff]  ;;  %v1067_v29 = vld [vmem:[%s2557_s17] ss:$0 sm:$0xff]  ;;  %v641_v44 = vld [vmem:[#allocation4] sm:$0xff] }
 0x203   : > { %1115 = vmatpush3.xpose.msra.mxu0 %v558_v13  ;;  %v543_v28 = vld [vmem:[#allocation2] sm:$0xff]  ;;  %v637_v34 = vld [vmem:[#allocation3] sm:$0xff] }
 0x204   : > { %1116 = vmatprep.subr.mxu0 %v1894_v12 }
 0x207   : > { %1117 = vmatpush3.xpose.msra.mxu0 %v557_v14 }
 0x208   : > { %1118 = vmatprep.subr.mxu0 %v1894_v12 }
 0x20b   : > { %1119 = vmatpush3.xpose.msra.mxu0 %v556_v15 }
 0x20c   : > { %1120 = vmatprep.subr.mxu0 %v1894_v12 }
 0x20f   : > { %1121 = vmatpush3.xpose.msra.mxu0 %v555_v16 }
 0x210   : > { %1122 = vmatprep.subr.mxu0 %v1894_v12 }
 0x213   : > { %1123 = vmatpush3.xpose.msra.mxu0 %v554_v17 }
 0x214   : > { %1124 = vmatprep.subr.mxu0 %v1894_v12 }
 0x217   : > { %1125 = vmatpush3.xpose.msra.mxu0 %v553_v18 }
 0x218   : > { %1126 = vmatprep.subr.mxu0 %v1894_v12 }
 0x21b   : > { %1127 = vmatpush3.xpose.msra.mxu0 %v552_v19 }
 0x21c   : > { %1128 = vmatprep.subr.mxu0 %v1894_v12 }
 0x21f   : > { %1129 = vmatpush3.xpose.msra.mxu0 %v551_v20 }
 0x220   : > { %1130 = vmatprep.subr.mxu0 %v1894_v12 }
 0x223   : > { %1131 = vmatpush3.xpose.msra.mxu0 %v550_v21 }
 0x224   : > { %1132 = vmatprep.subr.mxu0 %v1894_v12 }
 0x227   : > { %1133 = vmatpush3.xpose.msra.mxu0 %v549_v22 }
 0x228   : > { %1134 = vmatprep.subr.mxu0 %v1894_v12 }
 0x22b   : > { %1135 = vmatpush3.xpose.msra.mxu0 %v548_v23 }
 0x22c   : > { %1136 = vmatprep.subr.mxu0 %v1894_v12 }
 0x22f   : > { %1137 = vmatpush3.xpose.msra.mxu0 %v547_v24 }
 0x230   : > { %1138 = vmatprep.subr.mxu0 %v1894_v12 }
 0x233   : > { %1139 = vmatpush3.xpose.msra.mxu0 %v546_v25 }
 0x234   : > { %1140 = vmatprep.subr.mxu0 %v1894_v12 }
 0x237   : > { %1141 = vmatpush3.xpose.msra.mxu0 %v545_v26 }
 0x238   : > { %1142 = vmatprep.subr.mxu0 %v1894_v12 }
 0x23b   : > { %1143 = vmatpush3.xpose.msra.mxu0 %v544_v27 }
 0x23e   : > { %1145 = vmatmul.mubr.f32.vlgmr.msra.gmra.mxu0 %v543_v28 }
 0x2fe   : > { %v633_v30 = vpop.f32.mrf.mxu0 }
 0x2ff   : > { %v634_v31 = vadd.f32 %v1067_v29, %v633_v30 }
 0x300   : > { %v1146_v32 = vpop.f32.mrf.mxu0 }
 0x301   : > { %665 = vst [vmem:[%s664_s20] sm:$0xff] %v634_v31  ;;  %638 = vmax.xlane.f32.xlu0 %v634_v31 }
 0x38a   : > { %v639_v35 = vpop.xlane.xlu0 %638 }
 0x38b   : > { %v640_v36 = vmax.f32 %v637_v34, %v639_v35 }
 0x38d   : > { %v642_v37 = vsub.f32 %v637_v34, %v640_v36  ;;  %659 = vst.msk [vmem:[#allocation3] sm:$0xff] %vm657_vm2, %v640_v36  ;;  %648 = vperm.xlu0 %1300, %v640_v36  }
 0x38f   : > { %v643_v42 = vmul.f32 1.442695, %v642_v37 }
 0x408   : > { %v649_v38 = vpop.permute.xlu0 %648 }
 0x409   : > { %v651_v39 = vsub.f32 %v634_v31, %v649_v38 }
 0x40b   : > { %v652_v40 = vmul.f32 1.442695, %v651_v39 }
 0x40d   : > { %1301 = vpow2.f32 %v652_v40 }
 0x40e   : > { %1303 = vpow2.f32 %v643_v42 }
 0x41a   : > { %v1302_v41 = vpop.eup %1301 }
 0x41b   : > { %654 = vadd.xlane.f32.xlu1 %v1302_v41  ;;  %v1304_v43 = vpop.eup %1303 }
 0x41c   : > { %v645_v45 = vmul.f32 %v1304_v43, %v641_v44 }
 0x4a3   : > { %669 = sbr.rel (%p1070_p10) target bundleno = 1344 (0x540), region = 115 }
 0x4a4   : > { %v655_v46 = vpop.xlane.xlu1 %654 }
 0x4a5   : > { %v656_v47 = vadd.f32 %v655_v46, %v645_v45 }
 0x4a7   : > { %658 = vst.msk [vmem:[#allocation4] sm:$0xff] %vm657_vm2, %v656_v47 }
 0x4a8   : > { %v1897_v49 = vmov 0   ;;  %v670_v51 = vld [vmem:[#allocation3] sm:$0xff]  ;;  %v676_v55 = vld [vmem:[%s2061_s5 + $0x8] sm:$0xff] }
 0x4a9   : > { %1305 = vset.pattern.permute.xlu0 %v1897_v49  ;;  %v675_v54 = vld [vmem:[%s2061_s5] sm:$0xff] }
 0x4ae   : > { %v671_v48 = vld [vmem:[#allocation4] sm:$0xff] }
 0x4af   : > { %1306 = vlog2.f32 %v671_v48 }
 0x4bc   : > { %v1307_v50 = vpop.eup %1306 }
 0x4bd   : > { %v673_v52 = vmul.f32 0.6931472, %v1307_v50 }
 0x4bf   : > { %v674_v53 = vadd.f32 %v673_v52, %v670_v51 }
 0x4c1   : > { %679 = vperm.xlu0 %1305, %v674_v53  }
 0x53c   : > { %v680_v56 = vpop.permute.xlu0 %679 }
 0x53d   : > { %v682_v57 = vsub.f32 %v675_v54, %v680_v56  ;;  %v683_v58 = vsub.f32 %v676_v55, %v680_v56 }
 0x53f   : > { %684 = vst [vmem:[%s2061_s5] sm:$0xff] %v682_v57  ;;  %685 = vst [vmem:[%s2061_s5 + $0x8] sm:$0xff] %v683_v58 }
 0x540 PF: > { %s2558_s25 = sld [smem:[#allocation71_spill]]  ;;  %s701_s4 = sshll.u32 %s2061_s5, 4  ;;  %s702_s4 = int_to_ptr.vmem [resolvable:$true] %s701_s4 }
 0x541   : > { %s2559_s6 = sld [smem:[#allocation67_spill]]  ;;  %s1732_s26 = scalar_lea.vmem %s702_s4, 256 }
 0x542   : > { %s2561_s15 = sld [smem:[#allocation82_spill]]  ;;  %p1733_p12 = scmp.ne.s32.totalorder %s702_s4, %s1732_s26 }
 0x543   : > { %s1898_s16 = smov [#allocation12]  }
 0x544   : > { %p1734_p0 = pnand %p1733_p12, %p2015_p3  ;;  %s1736_s19 = sshll.u32 %s1898_s16, 4  ;;  %s1737_s19 = int_to_ptr.vmem [resolvable:$false] %s1736_s19 }
 0x545   : > { %s1738_s18 = scalar_lea.vmem %s1737_s19, 512  ;;  %p1739_p2 = scmp.lt.s32.totalorder %s702_s4, %s1737_s19 }
 0x546   : > { %s1094_s24 = sshll.u32 %s2558_s25, 8  ;;  %p1735_p1 = pneg %p1734_p0 }
 0x547   : > { %s2562_s13 = sand.u32 1, %s2559_s6   ;;  %p1740_p4 = scmp.lt.s32.totalorder %s1738_s18, %s1732_s26 }
 0x548   : > { %s699_s14 = scalar_lea.hbm %s2561_s15, %s1094_s24  ;;  %s687_s30 = scalar_lea.sflag [#allocation11], %s2562_s13 }
 0x549   : > { %p1741_p8 = por %p1740_p4, %p1739_p2 }
 0x54b   : > { %p1742_p5 = pnand %p1741_p8, %p1735_p1 }
 0x54d   : > { %1745 = shalt.err (!%p1742_p5)
}
 0x54e   : > { %s1746_s0 = scalar_lea.hbm %s699_s14, 256  ;;  %s1750_s29 = scalar_lea.hbm %s2561_s15, 512 }
 0x54f   : > { %p1747_p9 = scmp.ne.s32.totalorder %s699_s14, %s1746_s0  ;;  %p1751_p6 = scmp.lt.s32.totalorder %s699_s14, %s2561_s15 }
 0x550   : > { %p1752_p13 = scmp.lt.s32.totalorder %s1750_s29, %s1746_s0 }
 0x551   : > { %p1748_p11 = pnand %p1747_p9, %p2015_p3 }
 0x552   : > { %p1753_p10 = por %p1752_p13, %p1751_p6 }
 0x553   : > { %p1749_p7 = pneg %p1748_p11 }
 0x555   : > { %p1754_p12 = pnand %p1753_p10, %p1749_p7 }
 0x557   : > { %1757 = shalt.err (!%p1754_p12)
}
 0x558   : > { %1174 = dma.vmem_to_hbm [thread:$0]  (%p2015_p3), %s702_s4, 256, %s699_s14, %s687_s30  }
 0x559 PF: > { %s2563_s8 = sld [smem:[#allocation74_spill]] }
 0x55a   : > { %s2564_s21 = sld [smem:[#allocation66_spill]] }
 0x55b   : > { %s2565_s28 = sld [smem:[#allocation80_spill]] }
 0x55f   : > { %p1186_p0 = scmp.ge.s32.totalorder %s2563_s8, 2 }
 0x560   : > { %s713_s11 = sand.u32 1, %s2564_s21  }
 0x561   : > { %p2566_p1 = scmp.ne.s32.totalorder %s2565_s28, 0  ;;  %s714_s7 = scalar_lea.sflag [#allocation11], %s713_s11 }
 0x563   : > { %p1181_p2 = pnand %p1186_p0, %p2566_p1 }
 0x565   : > { %p1182_p4 = pneg %p1181_p2 }
 0x567   : > { %1829 = dma.done.wait (%p1182_p4), %s714_s7, 256  }
 0x568   : > { %1831 = vsyncadd (%p1182_p4), %s714_s7, 4294967040  ;;  %s26_s29 = sadd.s32 1, %s2563_s8   ;;  %s2567_s20 = sld [smem:[#allocation67_spill]] }
 0x569   : > { %p23_p8 = scmp.ge.s32.totalorder %s26_s29, 6   ;;  %s2568_s0 = sld [smem:[#allocation68_spill]] }
 0x56a   : > { %s2569_s21 = sld [smem:[#allocation78_spill]] }
 0x56b   : > { %s2570_s22 = sld [smem:[#allocation69_spill]] }
 0x56c   : > { %s2571_s23 = sld [smem:[#allocation70_spill]] }
 0x56d   : > { %s2572_s24 = sld [smem:[#allocation77_spill]]  ;;  %25 = sbr.rel (!%p23_p8) target bundleno = 25 (0x19), region = 242 }
 0x56e   : > { %s2573_s25 = sld [smem:[#allocation72_spill]] }
 0x56f   : > { %s2574_s26 = sld [smem:[#allocation73_spill]] }
 0x570   : > { %s2575_s27 = sld [smem:[#allocation75_spill]] }
 0x571   : > { %s2576_s28 = sld [smem:[#allocation76_spill]] }
 0x572   :  { %719 = vsyncpa [#allocation10], 1 }
 0x573   :  { %721 = vsyncpa [#allocation10 + $0x1], 1 }
 0x574   :  { %722 = vsyncpa [#allocation11], 1 }
 0x575   :  { %724 = vsyncpa [#allocation11 + $0x1], 1 }
 0x576   :  { %725 = vsyncmov [#allocation6] }
 0x579   :  { %s726_s12 = vpop.sfrf %725 }
 0x57a   :  { %p1076_p3 = scmp.ne.s32.totalorder %s726_s12, 0 }
 0x57c   :  { %730 = shalt.err (%p1076_p3)  }
 0x57d   :  { %732 = vsyncmov [#allocation6 + $0x1] }
 0x580   :  { %s733_s17 = vpop.sfrf %732 }
 0x581   :  { %p1077_p5 = scmp.ne.s32.totalorder %s733_s17, 0 }
 0x583   :  { %737 = shalt.err (%p1077_p5)  }
 0x584   :  { %739 = vsyncmov [#allocation6 + $0x2] }
 0x587   :  { %s740_s6 = vpop.sfrf %739 }
 0x588   :  { %p1078_p9 = scmp.ne.s32.totalorder %s740_s6, 0 }
 0x58a   :  { %744 = shalt.err (%p1078_p9)  }
 0x58b   :  { %746 = vsyncmov [#allocation6 + $0x3] }
 0x58e   :  { %s747_s9 = vpop.sfrf %746 }
 0x58f   :  { %p1079_p11 = scmp.ne.s32.totalorder %s747_s9, 0 }
 0x591   :  { %751 = shalt.err (%p1079_p11)  }
 0x592   :  { %753 = vsyncmov [#allocation6 + $0x4] }
 0x595   :  { %s754_s1 = vpop.sfrf %753 }
 0x596   :  { %p1080_p7 = scmp.ne.s32.totalorder %s754_s1, 0 }
 0x598   :  { %758 = shalt.err (%p1080_p7)  }
 0x599   :  { %760 = vsyncmov [#allocation6 + $0x5] }
 0x59c   :  { %s761_s3 = vpop.sfrf %760 }
 0x59d   :  { %p1081_p6 = scmp.ne.s32.totalorder %s761_s3, 0 }
 0x59f   :  { %765 = shalt.err (%p1081_p6)  }
 0x5a0   :  { %767 = vsyncmov [#allocation6 + $0x6] }
 0x5a3   :  { %s768_s20 = vpop.sfrf %767 }
 0x5a4   :  { %p1082_p13 = scmp.ne.s32.totalorder %s768_s20, 0 }
 0x5a6   :  { %772 = shalt.err (%p1082_p13)  }
 0x5a7   :  { %774 = vsyncmov [#allocation6 + $0x7] }
 0x5aa   :  { %s775_s25 = vpop.sfrf %774 }
 0x5ab   :  { %p1083_p10 = scmp.ne.s32.totalorder %s775_s25, 0 }
 0x5ad   :  { %779 = shalt.err (%p1083_p10)  }
 0x5ae   :  { %781 = vsyncmov [#allocation6 + $0x8] }
 0x5b1   :  { %s782_s24 = vpop.sfrf %781 }
 0x5b2   :  { %p1084_p12 = scmp.ne.s32.totalorder %s782_s24, 0 }
 0x5b4   :  { %786 = shalt.err (%p1084_p12)  }
 0x5b5   :  { %788 = vsyncmov [#allocation6 + $0x9] }
 0x5b8   :  { %s789_s22 = vpop.sfrf %788 }
 0x5b9   :  { %p1085_p0 = scmp.ne.s32.totalorder %s789_s22, 0 }
 0x5bb   :  { %793 = shalt.err (%p1085_p0)  }
 0x5bc   :  { %795 = vsyncmov [#allocation6 + $0xa] }
 0x5bf   :  { %s796_s23 = vpop.sfrf %795 }
 0x5c0   :  { %p1086_p1 = scmp.ne.s32.totalorder %s796_s23, 0 }
 0x5c2   :  { %800 = shalt.err (%p1086_p1)  }
 0x5c3   :  { %802 = vsyncmov [#allocation6 + $0xb] }
 0x5c6   :  { %s803_s15 = vpop.sfrf %802 }
 0x5c7   :  { %p1087_p2 = scmp.ne.s32.totalorder %s803_s15, 0 }
 0x5c9   :  { %807 = shalt.err (%p1087_p2)  }
 0x5ca   :  { %809 = vsyncmov [#allocation6 + $0xc] }
 0x5cd   :  { %s810_s14 = vpop.sfrf %809 }
 0x5ce   :  { %p1088_p4 = scmp.ne.s32.totalorder %s810_s14, 0 }
 0x5d0   :  { %814 = shalt.err (%p1088_p4)  }
 0x5d1   :  { %816 = vsyncmov [#allocation6 + $0xd] }
 0x5d4   :  { %s817_s4 = vpop.sfrf %816 }
 0x5d5   :  { %p1089_p8 = scmp.ne.s32.totalorder %s817_s4, 0 }
 0x5d7   :  { %821 = shalt.err (%p1089_p8)  }
 0x5d8   :  { %823 = vsyncmov [#allocation6 + $0xe] }
 0x5db   :  { %s824_s13 = vpop.sfrf %823 }
 0x5dc   :  { %p1090_p3 = scmp.ne.s32.totalorder %s824_s13, 0 }
 0x5de   :  { %828 = shalt.err (%p1090_p3)  }
 0x5df   :  { %830 = vsyncmov [#allocation6 + $0xf] }
 0x5e2   :  { %s831_s30 = vpop.sfrf %830 }
 0x5e3   :  { %p1091_p5 = scmp.ne.s32.totalorder %s831_s30, 0 }
 0x5e5   :  { %835 = shalt.err (%p1091_p5)  }

</bundles_post_ra>
